<compile_context>
chip_gen: v7x
topology: tpu7x:2x2x1
jax: 0.10.0
libtpu: 0.0.40
codegen_flags: <defaults>
</compile_context>

<pallas_src>
import functools

import jax
import jax.numpy as jnp
from jax import lax
from jax.experimental import pallas as pl
from jax.experimental.pallas import tpu as pltpu


def _lif_recurrence_kernel(z_ref, c_mem_ref, c_syn_ref,
                           spk_ref, v_ref, i_ref, *, v_th, n_steps, unroll):
    """One (plane-tile, time-chunk) grid step of the LIF recurrence.

    z_ref:        (TC, *plane) precomputed fc_input outputs for this chunk
    c_*_ref:      (1, *plane)  dt * clamped inverse time constants (resident)
    spk_ref:      (TC, *plane) output spikes for this chunk
    v_ref, i_ref: (1, *plane)  final LIF state; constant index map along the
                  time axis so they double as the carried state across chunks.
    `plane` is either (BH,) (fallback) or (8, BH//8) (sublane-packed).
    """
    c = pl.program_id(1)  # time-chunk index (the "arbitrary" sequential axis)

    # senc=None in the module => v = v_leak = 0, i = 0 at the first timestep.
    @pl.when(c == 0)
    def _init():
        v_ref[...] = jnp.zeros_like(v_ref)
        i_ref[...] = jnp.zeros_like(i_ref)

    # Read the (tiny) coefficient planes once per chunk; reused by every step.
    c_mem = c_mem_ref[...]        # = dt * clamp(tau_mem_enc, 0, 1)
    c_syn = c_syn_ref[...]        # = dt * clamp(tau_syn_enc, 0, 1)

    tail = (slice(None),) * (len(z_ref.shape) - 1)

    def step(ts, carry):
        v, i = carry
        z_in = z_ref[(pl.ds(ts, 1),) + tail]          # (1, *plane)
        v_d = v + c_mem * (i - v)                     # v + dt*tmi*((0-v)+i)
        i_d = i - c_syn * i                           # i - dt*tsi*i
        z = (v_d > v_th).astype(jnp.float32)          # SuperSpike fwd = heaviside
        spk_ref[(pl.ds(ts, 1),) + tail] = z
        v_new = v_d - z * v_d                         # (1 - z) * v_d, v_reset = 0
        i_new = i_d + z_in
        return v_new, i_new

    v_fin, i_fin = lax.fori_loop(0, n_steps, step, (v_ref[...], i_ref[...]),
                                 unroll=unroll)
    v_ref[...] = v_fin
    i_ref[...] = i_fin


def _pick_time_chunk(T, tile_elems, *, need_mult8, cap=64,
                     vmem_budget_bytes=24 << 20):
    """Largest time chunk <= cap that divides T, fits a VMEM budget and (for
    the 2-D fallback layout) respects the (8, 128) sublane rule."""
    row_bytes = 4 * tile_elems
    cap = max(1, min(cap, vmem_budget_bytes // max(1, 6 * row_bytes)))
    if T <= cap:
        return T                      # tc == T is always a legal block extent
    for tc in range(cap, 0, -1):
        if T % tc == 0 and (tc % 8 == 0 or not need_mult8):
            return tc
    return T


def snn_encode_forward(x, w_fc, tau_syn_enc, tau_mem_enc, *,
                       dt=1.0, v_th=1.0, time_chunk=None):
    """x: (B, T, N_in) float32; w_fc: (H, N_in) (torch Linear layout);
    tau_*_enc: (1, H).  Returns (spikes (T, B, H), (v, i) each (B, H))."""
    B, T, N = x.shape
    H = w_fc.shape[0]
    BH = B * H

    x = x.astype(jnp.float32)
    w = jnp.transpose(w_fc.astype(jnp.float32))              # (N_in, H)

    # ---- Hoisted, state-independent GEMM: one MXU-shaped matmul for all T
    # timesteps instead of T tiny (B x N x H) matmuls inside the recurrence.
    z_in = jnp.einsum("btn,nh->tbh", x, w,
                      precision=lax.Precision.HIGHEST,
                      preferred_element_type=jnp.float32)    # (T, B, H)
    z_flat = z_in.reshape(T, BH)                             # free trailing reshape

    # ---- Coefficient planes, computed once (module clamps per forward call).
    tmi = jnp.clip(tau_mem_enc.astype(jnp.float32).reshape(1, H), 0.0, 1.0)
    tsi = jnp.clip(tau_syn_enc.astype(jnp.float32).reshape(1, H), 0.0, 1.0)
    c_mem = jnp.tile(dt * tmi, (1, B))                       # (1, B*H)
    c_syn = jnp.tile(dt * tsi, (1, B))

    # ---- Layout: sublane-packed (8, BH/8) plane when it tiles perfectly into
    # full (8, 128) vregs; otherwise the simple 2-D (T, BH) layout.
    packed = (BH % (8 * 128) == 0)
    if packed:
        S = 8
        L = BH // S
        n_planes = 2 if (L % 256) == 0 else 1                # tiles stay %128 lanes
        tl = L // n_planes
        z_k = z_flat.reshape(T, S, L)
        c_mem_k = c_mem.reshape(1, S, L)
        c_syn_k = c_syn.reshape(1, S, L)
        tile_elems = S * tl
        z_spec = pl.BlockSpec((None if False else (time_chunk or 0), S, tl), None)  # placeholder, rebuilt below
    else:
        S = 1
        L = BH
        n_planes = 2 if (BH % 256) == 0 else 1
        tl = BH // n_planes
        z_k = z_flat
        c_mem_k, c_syn_k = c_mem, c_syn
        tile_elems = tl

    # ---- Time chunking.
    if time_chunk is not None:
        tc = int(time_chunk)
        if T % tc != 0:
            raise ValueError(f"time_chunk={tc} must divide T={T}")
        if (not packed) and tc != T and tc % 8 != 0:
            raise ValueError(f"time_chunk={tc} must be a multiple of 8 (or == T)")
    else:
        tc = _pick_time_chunk(T, tile_elems, need_mult8=not packed)
    nc = T // tc
    unroll = True if tc <= 32 else 8

    kernel = functools.partial(_lif_recurrence_kernel, v_th=float(v_th),
                               n_steps=tc, unroll=unroll)

    # ---- Block specs (grid = (plane tiles, time chunks)).
    if packed:
        z_spec = pl.BlockSpec((tc, S, tl), lambda b, c: (c, 0, b))
        spk_spec = pl.BlockSpec((tc, S, tl), lambda b, c: (c, 0, b))
        coef_spec = pl.BlockSpec((1, S, tl), lambda b, c: (0, 0, b))
        state_spec = pl.BlockSpec((1, S, tl), lambda b, c: (0, 0, b))
        spike_shape = (T, S, L)
        state_shape = (1, S, L)
    else:
        z_spec = pl.BlockSpec((tc, tl), lambda b, c: (c, b))
        spk_spec = pl.BlockSpec((tc, tl), lambda b, c: (c, b))
        coef_spec = pl.BlockSpec((1, tl), lambda b, c: (0, b))
        state_spec = pl.BlockSpec((1, tl), lambda b, c: (0, b))
        spike_shape = (T, BH)
        state_shape = (1, BH)

    # Explicit VMEM budget: double-buffered z_in / spike chunks plus the
    # resident coefficient and state planes, with margin.  Capped below v7x's
    # 64 MiB per-core VMEM; also fine for v5e/v6e's 128 MiB.
    block_bytes = 4 * (4 * tc * tile_elems + 6 * tile_elems)
    vmem_limit = int(min(max(4 * block_bytes, 16 << 20), 56 << 20))

    spikes, v_fin, i_fin = pl.pallas_call(
        kernel,
        out_shape=(
            jax.ShapeDtypeStruct(spike_shape, jnp.float32),  # spikes (exact 0/1)
            jax.ShapeDtypeStruct(state_shape, jnp.float32),  # final v
            jax.ShapeDtypeStruct(state_shape, jnp.float32),  # final i
        ),
        grid_spec=pltpu.PrefetchScalarGridSpec(
            num_scalar_prefetch=0,
            grid=(n_planes, nc),      # (parallel plane tiles, sequential time chunks)
            in_specs=[z_spec, coef_spec, coef_spec],
            out_specs=[spk_spec, state_spec, state_spec],
        ),
        compiler_params=pltpu.CompilerParams(
            dimension_semantics=("parallel", "arbitrary"),
            vmem_limit_bytes=vmem_limit,
        ),
    )(z_k, c_mem_k, c_syn_k)

    # TODO(synk): neuron_mask (zeroing selected hidden units) and record-mode
    # state traces are not implemented; module defaults are None / False.
    spikes = spikes.reshape(T, B, H)
    return spikes, (v_fin.reshape(B, H), i_fin.reshape(B, H))


def _reference_forward(x, w_fc, tau_syn_enc, tau_mem_enc, dt=1.0, v_th=1.0):
    """Pure-JAX mirror of the PyTorch forward, for verification."""
    B, T, N = x.shape
    H = w_fc.shape[0]
    tsi = jnp.clip(tau_syn_enc, 0.0, 1.0)
    tmi = jnp.clip(tau_mem_enc, 0.0, 1.0)
    v = jnp.zeros((B, H), jnp.float32)
    i = jnp.zeros((B, H), jnp.float32)
    outs = []
    for ts in range(T):
        z_in = jnp.matmul(x[:, ts, :], w_fc.T, precision=lax.Precision.HIGHEST)
        v_d = v + dt * tmi * ((0.0 - v) + i)
        i_d = i - dt * tsi * i
        z = (v_d - v_th > 0.0).astype(jnp.float32)
        v = (1.0 - z) * v_d
        i = i_d + z_in
        outs.append(z)
    return jnp.stack(outs), (v, i)


def _run_case(B, T, N_IN, H, time_chunk=None, seed=0):
    key = jax.random.PRNGKey(seed)
    kx, kw = jax.random.split(key)
    x = jax.random.normal(kx, (B, T, N_IN), dtype=jnp.float32) * 2.0
    bound = 1.0 / float(N_IN) ** 0.5   # Linear weight ~ U(-1/sqrt(N), 1/sqrt(N))
    w_fc = jax.random.uniform(kw, (H, N_IN), dtype=jnp.float32,
                              minval=-bound, maxval=bound)
    tau_syn_enc = jnp.full((1, H), 0.1, dtype=jnp.float32)   # tau_syn default
    tau_mem_enc = jnp.full((1, H), 0.05, dtype=jnp.float32)  # tau_mem default

    spikes, (v_fin, i_fin) = snn_encode_forward(
        x, w_fc, tau_syn_enc, tau_mem_enc, dt=1.0, v_th=1.0,
        time_chunk=time_chunk)
    jax.block_until_ready((spikes, v_fin, i_fin))

    spikes_ref, (v_ref, i_ref) = _reference_forward(
        x, w_fc, tau_syn_enc, tau_mem_enc, dt=1.0, v_th=1.0)

    assert spikes.shape == (T, B, H)
    assert jnp.allclose(spikes, spikes_ref, atol=1e-5)
    assert jnp.allclose(v_fin, v_ref, atol=1e-5)
    assert jnp.allclose(i_fin, i_ref, atol=1e-5)


if __name__ == "__main__":
    # Module-default-ish small shapes: batch=2, seq=32, input=16, hidden=32.
    _run_case(2, 32, 16, 32)                  # 2-D fallback layout, single chunk
    _run_case(2, 32, 16, 32, time_chunk=8)    # 4 sequential chunks carrying v/i
    _run_case(4, 16, 16, 256)                 # sublane-packed (8, 128) plane
    _run_case(8, 16, 16, 256, time_chunk=8)   # packed + 2 "parallel" lane tiles
    print("KERNEL_OK")
</pallas_src>

<mosaic_0001>
module attributes {stable_mosaic.version = 11 : i64} {
  func.func @_lif_recurrence_kernel(%arg0: i32, %arg1: i32, %arg2: memref<32x64xf32, #tpu.memory_space<vmem>>, %arg3: memref<1x64xf32, #tpu.memory_space<vmem>>, %arg4: memref<1x64xf32, #tpu.memory_space<vmem>>, %arg5: memref<32x64xf32, #tpu.memory_space<vmem>>, %arg6: memref<1x64xf32, #tpu.memory_space<vmem>>, %arg7: memref<1x64xf32, #tpu.memory_space<vmem>>) attributes {dimension_semantics = [#tpu.dimension_semantics<parallel>, #tpu.dimension_semantics<arbitrary>], iteration_bounds = array<i64: 1, 1>, scalar_prefetch = 0 : i64, scratch_operands = 0 : i64, tpu.core_type = #tpu.core_type<tc>, window_params = [{transform_indices = @transform_0, window_bounds = array<i64: 32, 64>}, {transform_indices = @transform_1, window_bounds = array<i64: 1, 64>}, {transform_indices = @transform_2, window_bounds = array<i64: 1, 64>}, {transform_indices = @transform_3, window_bounds = array<i64: 32, 64>}, {transform_indices = @transform_4, window_bounds = array<i64: 1, 64>}, {transform_indices = @transform_5, window_bounds = array<i64: 1, 64>}]} {
    %c0_i32 = arith.constant 0 : i32
    %0 = arith.cmpi eq, %arg1, %c0_i32 : i32
    %1 = arith.extui %0 : i1 to i32
    %c0_i32_0 = arith.constant 0 : i32
    %2 = arith.cmpi ne, %1, %c0_i32_0 : i32
    scf.if %2 {
      %cst_108 = arith.constant 0.000000e+00 : f32
      %521 = vector.broadcast %cst_108 : f32 to vector<1x64xf32>
      %c0_109 = arith.constant 0 : index
      %c0_110 = arith.constant 0 : index
      %522 = vector.load %arg6[%c0_109, %c0_110] : memref<1x64xf32, #tpu.memory_space<vmem>>, vector<1x64xf32>
      tpu.vector_store %arg6[%c0_109, %c0_110], %521 {strides = array<i32>} : memref<1x64xf32, #tpu.memory_space<vmem>>, vector<1x64xf32>,
      %cst_111 = arith.constant 0.000000e+00 : f32
      %523 = vector.broadcast %cst_111 : f32 to vector<1x64xf32>
      %c0_112 = arith.constant 0 : index
      %c0_113 = arith.constant 0 : index
      %524 = vector.load %arg7[%c0_112, %c0_113] : memref<1x64xf32, #tpu.memory_space<vmem>>, vector<1x64xf32>
      tpu.vector_store %arg7[%c0_112, %c0_113], %523 {strides = array<i32>} : memref<1x64xf32, #tpu.memory_space<vmem>>, vector<1x64xf32>,
    } else {
    }
    %c0 = arith.constant 0 : index
    %c0_1 = arith.constant 0 : index
    %3 = vector.load %arg3[%c0, %c0_1] : memref<1x64xf32, #tpu.memory_space<vmem>>, vector<1x64xf32>
    %c0_2 = arith.constant 0 : index
    %c0_3 = arith.constant 0 : index
    %4 = vector.load %arg4[%c0_2, %c0_3] : memref<1x64xf32, #tpu.memory_space<vmem>>, vector<1x64xf32>
    %c0_4 = arith.constant 0 : index
    %c0_5 = arith.constant 0 : index
    %5 = vector.load %arg6[%c0_4, %c0_5] : memref<1x64xf32, #tpu.memory_space<vmem>>, vector<1x64xf32>
    %c0_6 = arith.constant 0 : index
    %c0_7 = arith.constant 0 : index
    %6 = vector.load %arg7[%c0_6, %c0_7] : memref<1x64xf32, #tpu.memory_space<vmem>>, vector<1x64xf32>
    %c0_i32_8 = arith.constant 0 : i32
    %7 = arith.index_cast %c0_i32_8 : i32 to index
    %c0_9 = arith.constant 0 : index
    %8 = vector.load %arg2[%7, %c0_9] : memref<32x64xf32, #tpu.memory_space<vmem>>, vector<1x64xf32>
    %9 = arith.subf %6, %5 : vector<1x64xf32>
    %10 = arith.mulf %3, %9 : vector<1x64xf32>
    %11 = arith.addf %5, %10 : vector<1x64xf32>
    %12 = arith.mulf %4, %6 : vector<1x64xf32>
    %13 = arith.subf %6, %12 : vector<1x64xf32>
    %cst = arith.constant 1.000000e+00 : f32
    %14 = vector.broadcast %cst : f32 to vector<1x64xf32>
    %15 = arith.cmpf ogt, %11, %14 : vector<1x64xf32>
    %16 = arith.extui %15 : vector<1x64xi1> to vector<1x64xi32>
    %17 = arith.sitofp %16 : vector<1x64xi32> to vector<1x64xf32>
    %18 = arith.index_cast %c0_i32_8 : i32 to index
    %c0_10 = arith.constant 0 : index
    %19 = vector.load %arg5[%18, %c0_10] : memref<32x64xf32, #tpu.memory_space<vmem>>, vector<1x64xf32>
    tpu.vector_store %arg5[%18, %c0_10], %17 {strides = array<i32>} : memref<32x64xf32, #tpu.memory_space<vmem>>, vector<1x64xf32>,
    %20 = arith.mulf %17, %11 : vector<1x64xf32>
    %21 = arith.subf %11, %20 : vector<1x64xf32>
    %22 = arith.addf %13, %8 : vector<1x64xf32>
    %c1_i32 = arith.constant 1 : i32
    %23 = arith.index_cast %c1_i32 : i32 to index
    %c0_11 = arith.constant 0 : index
    %24 = vector.load %arg2[%23, %c0_11] : memref<32x64xf32, #tpu.memory_space<vmem>>, vector<1x64xf32>
    %25 = arith.subf %22, %21 : vector<1x64xf32>
    %26 = arith.mulf %3, %25 : vector<1x64xf32>
    %27 = arith.addf %21, %26 : vector<1x64xf32>
    %28 = arith.mulf %4, %22 : vector<1x64xf32>
    %29 = arith.subf %22, %28 : vector<1x64xf32>
    %cst_12 = arith.constant 1.000000e+00 : f32
    %30 = vector.broadcast %cst_12 : f32 to vector<1x64xf32>
    %31 = arith.cmpf ogt, %27, %30 : vector<1x64xf32>
    %32 = arith.extui %31 : vector<1x64xi1> to vector<1x64xi32>
    %33 = arith.sitofp %32 : vector<1x64xi32> to vector<1x64xf32>
    %34 = arith.index_cast %c1_i32 : i32 to index
    %c0_13 = arith.constant 0 : index
    %35 = vector.load %arg5[%34, %c0_13] : memref<32x64xf32, #tpu.memory_space<vmem>>, vector<1x64xf32>
    tpu.vector_store %arg5[%34, %c0_13], %33 {strides = array<i32>} : memref<32x64xf32, #tpu.memory_space<vmem>>, vector<1x64xf32>,
    %36 = arith.mulf %33, %27 : vector<1x64xf32>
    %37 = arith.subf %27, %36 : vector<1x64xf32>
    %38 = arith.addf %29, %24 : vector<1x64xf32>
    %c2_i32 = arith.constant 2 : i32
    %39 = arith.index_cast %c2_i32 : i32 to index
    %c0_14 = arith.constant 0 : index
    %40 = vector.load %arg2[%39, %c0_14] : memref<32x64xf32, #tpu.memory_space<vmem>>, vector<1x64xf32>
    %41 = arith.subf %38, %37 : vector<1x64xf32>
    %42 = arith.mulf %3, %41 : vector<1x64xf32>
    %43 = arith.addf %37, %42 : vector<1x64xf32>
    %44 = arith.mulf %4, %38 : vector<1x64xf32>
    %45 = arith.subf %38, %44 : vector<1x64xf32>
    %cst_15 = arith.constant 1.000000e+00 : f32
    %46 = vector.broadcast %cst_15 : f32 to vector<1x64xf32>
    %47 = arith.cmpf ogt, %43, %46 : vector<1x64xf32>
    %48 = arith.extui %47 : vector<1x64xi1> to vector<1x64xi32>
    %49 = arith.sitofp %48 : vector<1x64xi32> to vector<1x64xf32>
    %50 = arith.index_cast %c2_i32 : i32 to index
    %c0_16 = arith.constant 0 : index
    %51 = vector.load %arg5[%50, %c0_16] : memref<32x64xf32, #tpu.memory_space<vmem>>, vector<1x64xf32>
    tpu.vector_store %arg5[%50, %c0_16], %49 {strides = array<i32>} : memref<32x64xf32, #tpu.memory_space<vmem>>, vector<1x64xf32>,
    %52 = arith.mulf %49, %43 : vector<1x64xf32>
    %53 = arith.subf %43, %52 : vector<1x64xf32>
    %54 = arith.addf %45, %40 : vector<1x64xf32>
    %c3_i32 = arith.constant 3 : i32
    %55 = arith.index_cast %c3_i32 : i32 to index
    %c0_17 = arith.constant 0 : index
    %56 = vector.load %arg2[%55, %c0_17] : memref<32x64xf32, #tpu.memory_space<vmem>>, vector<1x64xf32>
    %57 = arith.subf %54, %53 : vector<1x64xf32>
    %58 = arith.mulf %3, %57 : vector<1x64xf32>
    %59 = arith.addf %53, %58 : vector<1x64xf32>
    %60 = arith.mulf %4, %54 : vector<1x64xf32>
    %61 = arith.subf %54, %60 : vector<1x64xf32>
    %cst_18 = arith.constant 1.000000e+00 : f32
    %62 = vector.broadcast %cst_18 : f32 to vector<1x64xf32>
    %63 = arith.cmpf ogt, %59, %62 : vector<1x64xf32>
    %64 = arith.extui %63 : vector<1x64xi1> to vector<1x64xi32>
    %65 = arith.sitofp %64 : vector<1x64xi32> to vector<1x64xf32>
    %66 = arith.index_cast %c3_i32 : i32 to index
    %c0_19 = arith.constant 0 : index
    %67 = vector.load %arg5[%66, %c0_19] : memref<32x64xf32, #tpu.memory_space<vmem>>, vector<1x64xf32>
    tpu.vector_store %arg5[%66, %c0_19], %65 {strides = array<i32>} : memref<32x64xf32, #tpu.memory_space<vmem>>, vector<1x64xf32>,
    %68 = arith.mulf %65, %59 : vector<1x64xf32>
    %69 = arith.subf %59, %68 : vector<1x64xf32>
    %70 = arith.addf %61, %56 : vector<1x64xf32>
    %c4_i32 = arith.constant 4 : i32
    %71 = arith.index_cast %c4_i32 : i32 to index
    %c0_20 = arith.constant 0 : index
    %72 = vector.load %arg2[%71, %c0_20] : memref<32x64xf32, #tpu.memory_space<vmem>>, vector<1x64xf32>
    %73 = arith.subf %70, %69 : vector<1x64xf32>
    %74 = arith.mulf %3, %73 : vector<1x64xf32>
    %75 = arith.addf %69, %74 : vector<1x64xf32>
    %76 = arith.mulf %4, %70 : vector<1x64xf32>
    %77 = arith.subf %70, %76 : vector<1x64xf32>
    %cst_21 = arith.constant 1.000000e+00 : f32
    %78 = vector.broadcast %cst_21 : f32 to vector<1x64xf32>
    %79 = arith.cmpf ogt, %75, %78 : vector<1x64xf32>
    %80 = arith.extui %79 : vector<1x64xi1> to vector<1x64xi32>
    %81 = arith.sitofp %80 : vector<1x64xi32> to vector<1x64xf32>
    %82 = arith.index_cast %c4_i32 : i32 to index
    %c0_22 = arith.constant 0 : index
    %83 = vector.load %arg5[%82, %c0_22] : memref<32x64xf32, #tpu.memory_space<vmem>>, vector<1x64xf32>
    tpu.vector_store %arg5[%82, %c0_22], %81 {strides = array<i32>} : memref<32x64xf32, #tpu.memory_space<vmem>>, vector<1x64xf32>,
    %84 = arith.mulf %81, %75 : vector<1x64xf32>
    %85 = arith.subf %75, %84 : vector<1x64xf32>
    %86 = arith.addf %77, %72 : vector<1x64xf32>
    %c5_i32 = arith.constant 5 : i32
    %87 = arith.index_cast %c5_i32 : i32 to index
    %c0_23 = arith.constant 0 : index
    %88 = vector.load %arg2[%87, %c0_23] : memref<32x64xf32, #tpu.memory_space<vmem>>, vector<1x64xf32>
    %89 = arith.subf %86, %85 : vector<1x64xf32>
    %90 = arith.mulf %3, %89 : vector<1x64xf32>
    %91 = arith.addf %85, %90 : vector<1x64xf32>
    %92 = arith.mulf %4, %86 : vector<1x64xf32>
    %93 = arith.subf %86, %92 : vector<1x64xf32>
    %cst_24 = arith.constant 1.000000e+00 : f32
    %94 = vector.broadcast %cst_24 : f32 to vector<1x64xf32>
    %95 = arith.cmpf ogt, %91, %94 : vector<1x64xf32>
    %96 = arith.extui %95 : vector<1x64xi1> to vector<1x64xi32>
    %97 = arith.sitofp %96 : vector<1x64xi32> to vector<1x64xf32>
    %98 = arith.index_cast %c5_i32 : i32 to index
    %c0_25 = arith.constant 0 : index
    %99 = vector.load %arg5[%98, %c0_25] : memref<32x64xf32, #tpu.memory_space<vmem>>, vector<1x64xf32>
    tpu.vector_store %arg5[%98, %c0_25], %97 {strides = array<i32>} : memref<32x64xf32, #tpu.memory_space<vmem>>, vector<1x64xf32>,
    %100 = arith.mulf %97, %91 : vector<1x64xf32>
    %101 = arith.subf %91, %100 : vector<1x64xf32>
    %102 = arith.addf %93, %88 : vector<1x64xf32>
    %c6_i32 = arith.constant 6 : i32
    %103 = arith.index_cast %c6_i32 : i32 to index
    %c0_26 = arith.constant 0 : index
    %104 = vector.load %arg2[%103, %c0_26] : memref<32x64xf32, #tpu.memory_space<vmem>>, vector<1x64xf32>
    %105 = arith.subf %102, %101 : vector<1x64xf32>
    %106 = arith.mulf %3, %105 : vector<1x64xf32>
    %107 = arith.addf %101, %106 : vector<1x64xf32>
    %108 = arith.mulf %4, %102 : vector<1x64xf32>
    %109 = arith.subf %102, %108 : vector<1x64xf32>
    %cst_27 = arith.constant 1.000000e+00 : f32
    %110 = vector.broadcast %cst_27 : f32 to vector<1x64xf32>
    %111 = arith.cmpf ogt, %107, %110 : vector<1x64xf32>
    %112 = arith.extui %111 : vector<1x64xi1> to vector<1x64xi32>
    %113 = arith.sitofp %112 : vector<1x64xi32> to vector<1x64xf32>
    %114 = arith.index_cast %c6_i32 : i32 to index
    %c0_28 = arith.constant 0 : index
    %115 = vector.load %arg5[%114, %c0_28] : memref<32x64xf32, #tpu.memory_space<vmem>>, vector<1x64xf32>
    tpu.vector_store %arg5[%114, %c0_28], %113 {strides = array<i32>} : memref<32x64xf32, #tpu.memory_space<vmem>>, vector<1x64xf32>,
    %116 = arith.mulf %113, %107 : vector<1x64xf32>
    %117 = arith.subf %107, %116 : vector<1x64xf32>
    %118 = arith.addf %109, %104 : vector<1x64xf32>
    %c7_i32 = arith.constant 7 : i32
    %119 = arith.index_cast %c7_i32 : i32 to index
    %c0_29 = arith.constant 0 : index
    %120 = vector.load %arg2[%119, %c0_29] : memref<32x64xf32, #tpu.memory_space<vmem>>, vector<1x64xf32>
    %121 = arith.subf %118, %117 : vector<1x64xf32>
    %122 = arith.mulf %3, %121 : vector<1x64xf32>
    %123 = arith.addf %117, %122 : vector<1x64xf32>
    %124 = arith.mulf %4, %118 : vector<1x64xf32>
    %125 = arith.subf %118, %124 : vector<1x64xf32>
    %cst_30 = arith.constant 1.000000e+00 : f32
    %126 = vector.broadcast %cst_30 : f32 to vector<1x64xf32>
    %127 = arith.cmpf ogt, %123, %126 : vector<1x64xf32>
    %128 = arith.extui %127 : vector<1x64xi1> to vector<1x64xi32>
    %129 = arith.sitofp %128 : vector<1x64xi32> to vector<1x64xf32>
    %130 = arith.index_cast %c7_i32 : i32 to index
    %c0_31 = arith.constant 0 : index
    %131 = vector.load %arg5[%130, %c0_31] : memref<32x64xf32, #tpu.memory_space<vmem>>, vector<1x64xf32>
    tpu.vector_store %arg5[%130, %c0_31], %129 {strides = array<i32>} : memref<32x64xf32, #tpu.memory_space<vmem>>, vector<1x64xf32>,
    %132 = arith.mulf %129, %123 : vector<1x64xf32>
    %133 = arith.subf %123, %132 : vector<1x64xf32>
    %134 = arith.addf %125, %120 : vector<1x64xf32>
    %c8_i32 = arith.constant 8 : i32
    %135 = arith.index_cast %c8_i32 : i32 to index
    %c0_32 = arith.constant 0 : index
    %136 = vector.load %arg2[%135, %c0_32] : memref<32x64xf32, #tpu.memory_space<vmem>>, vector<1x64xf32>
    %137 = arith.subf %134, %133 : vector<1x64xf32>
    %138 = arith.mulf %3, %137 : vector<1x64xf32>
    %139 = arith.addf %133, %138 : vector<1x64xf32>
    %140 = arith.mulf %4, %134 : vector<1x64xf32>
    %141 = arith.subf %134, %140 : vector<1x64xf32>
    %cst_33 = arith.constant 1.000000e+00 : f32
    %142 = vector.broadcast %cst_33 : f32 to vector<1x64xf32>
    %143 = arith.cmpf ogt, %139, %142 : vector<1x64xf32>
    %144 = arith.extui %143 : vector<1x64xi1> to vector<1x64xi32>
    %145 = arith.sitofp %144 : vector<1x64xi32> to vector<1x64xf32>
    %146 = arith.index_cast %c8_i32 : i32 to index
    %c0_34 = arith.constant 0 : index
    %147 = vector.load %arg5[%146, %c0_34] : memref<32x64xf32, #tpu.memory_space<vmem>>, vector<1x64xf32>
    tpu.vector_store %arg5[%146, %c0_34], %145 {strides = array<i32>} : memref<32x64xf32, #tpu.memory_space<vmem>>, vector<1x64xf32>,
    %148 = arith.mulf %145, %139 : vector<1x64xf32>
    %149 = arith.subf %139, %148 : vector<1x64xf32>
    %150 = arith.addf %141, %136 : vector<1x64xf32>
    %c9_i32 = arith.constant 9 : i32
    %151 = arith.index_cast %c9_i32 : i32 to index
    %c0_35 = arith.constant 0 : index
    %152 = vector.load %arg2[%151, %c0_35] : memref<32x64xf32, #tpu.memory_space<vmem>>, vector<1x64xf32>
    %153 = arith.subf %150, %149 : vector<1x64xf32>
    %154 = arith.mulf %3, %153 : vector<1x64xf32>
    %155 = arith.addf %149, %154 : vector<1x64xf32>
    %156 = arith.mulf %4, %150 : vector<1x64xf32>
    %157 = arith.subf %150, %156 : vector<1x64xf32>
    %cst_36 = arith.constant 1.000000e+00 : f32
    %158 = vector.broadcast %cst_36 : f32 to vector<1x64xf32>
    %159 = arith.cmpf ogt, %155, %158 : vector<1x64xf32>
    %160 = arith.extui %159 : vector<1x64xi1> to vector<1x64xi32>
    %161 = arith.sitofp %160 : vector<1x64xi32> to vector<1x64xf32>
    %162 = arith.index_cast %c9_i32 : i32 to index
    %c0_37 = arith.constant 0 : index
    %163 = vector.load %arg5[%162, %c0_37] : memref<32x64xf32, #tpu.memory_space<vmem>>, vector<1x64xf32>
    tpu.vector_store %arg5[%162, %c0_37], %161 {strides = array<i32>} : memref<32x64xf32, #tpu.memory_space<vmem>>, vector<1x64xf32>,
    %164 = arith.mulf %161, %155 : vector<1x64xf32>
    %165 = arith.subf %155, %164 : vector<1x64xf32>
    %166 = arith.addf %157, %152 : vector<1x64xf32>
    %c10_i32 = arith.constant 10 : i32
    %167 = arith.index_cast %c10_i32 : i32 to index
    %c0_38 = arith.constant 0 : index
    %168 = vector.load %arg2[%167, %c0_38] : memref<32x64xf32, #tpu.memory_space<vmem>>, vector<1x64xf32>
    %169 = arith.subf %166, %165 : vector<1x64xf32>
    %170 = arith.mulf %3, %169 : vector<1x64xf32>
    %171 = arith.addf %165, %170 : vector<1x64xf32>
    %172 = arith.mulf %4, %166 : vector<1x64xf32>
    %173 = arith.subf %166, %172 : vector<1x64xf32>
    %cst_39 = arith.constant 1.000000e+00 : f32
    %174 = vector.broadcast %cst_39 : f32 to vector<1x64xf32>
    %175 = arith.cmpf ogt, %171, %174 : vector<1x64xf32>
    %176 = arith.extui %175 : vector<1x64xi1> to vector<1x64xi32>
    %177 = arith.sitofp %176 : vector<1x64xi32> to vector<1x64xf32>
    %178 = arith.index_cast %c10_i32 : i32 to index
    %c0_40 = arith.constant 0 : index
    %179 = vector.load %arg5[%178, %c0_40] : memref<32x64xf32, #tpu.memory_space<vmem>>, vector<1x64xf32>
    tpu.vector_store %arg5[%178, %c0_40], %177 {strides = array<i32>} : memref<32x64xf32, #tpu.memory_space<vmem>>, vector<1x64xf32>,
    %180 = arith.mulf %177, %171 : vector<1x64xf32>
    %181 = arith.subf %171, %180 : vector<1x64xf32>
    %182 = arith.addf %173, %168 : vector<1x64xf32>
    %c11_i32 = arith.constant 11 : i32
    %183 = arith.index_cast %c11_i32 : i32 to index
    %c0_41 = arith.constant 0 : index
    %184 = vector.load %arg2[%183, %c0_41] : memref<32x64xf32, #tpu.memory_space<vmem>>, vector<1x64xf32>
    %185 = arith.subf %182, %181 : vector<1x64xf32>
    %186 = arith.mulf %3, %185 : vector<1x64xf32>
    %187 = arith.addf %181, %186 : vector<1x64xf32>
    %188 = arith.mulf %4, %182 : vector<1x64xf32>
    %189 = arith.subf %182, %188 : vector<1x64xf32>
    %cst_42 = arith.constant 1.000000e+00 : f32
    %190 = vector.broadcast %cst_42 : f32 to vector<1x64xf32>
    %191 = arith.cmpf ogt, %187, %190 : vector<1x64xf32>
    %192 = arith.extui %191 : vector<1x64xi1> to vector<1x64xi32>
    %193 = arith.sitofp %192 : vector<1x64xi32> to vector<1x64xf32>
    %194 = arith.index_cast %c11_i32 : i32 to index
    %c0_43 = arith.constant 0 : index
    %195 = vector.load %arg5[%194, %c0_43] : memref<32x64xf32, #tpu.memory_space<vmem>>, vector<1x64xf32>
    tpu.vector_store %arg5[%194, %c0_43], %193 {strides = array<i32>} : memref<32x64xf32, #tpu.memory_space<vmem>>, vector<1x64xf32>,
    %196 = arith.mulf %193, %187 : vector<1x64xf32>
    %197 = arith.subf %187, %196 : vector<1x64xf32>
    %198 = arith.addf %189, %184 : vector<1x64xf32>
    %c12_i32 = arith.constant 12 : i32
    %199 = arith.index_cast %c12_i32 : i32 to index
    %c0_44 = arith.constant 0 : index
    %200 = vector.load %arg2[%199, %c0_44] : memref<32x64xf32, #tpu.memory_space<vmem>>, vector<1x64xf32>
    %201 = arith.subf %198, %197 : vector<1x64xf32>
    %202 = arith.mulf %3, %201 : vector<1x64xf32>
    %203 = arith.addf %197, %202 : vector<1x64xf32>
    %204 = arith.mulf %4, %198 : vector<1x64xf32>
    %205 = arith.subf %198, %204 : vector<1x64xf32>
    %cst_45 = arith.constant 1.000000e+00 : f32
    %206 = vector.broadcast %cst_45 : f32 to vector<1x64xf32>
    %207 = arith.cmpf ogt, %203, %206 : vector<1x64xf32>
    %208 = arith.extui %207 : vector<1x64xi1> to vector<1x64xi32>
    %209 = arith.sitofp %208 : vector<1x64xi32> to vector<1x64xf32>
    %210 = arith.index_cast %c12_i32 : i32 to index
    %c0_46 = arith.constant 0 : index
    %211 = vector.load %arg5[%210, %c0_46] : memref<32x64xf32, #tpu.memory_space<vmem>>, vector<1x64xf32>
    tpu.vector_store %arg5[%210, %c0_46], %209 {strides = array<i32>} : memref<32x64xf32, #tpu.memory_space<vmem>>, vector<1x64xf32>,
    %212 = arith.mulf %209, %203 : vector<1x64xf32>
    %213 = arith.subf %203, %212 : vector<1x64xf32>
    %214 = arith.addf %205, %200 : vector<1x64xf32>
    %c13_i32 = arith.constant 13 : i32
    %215 = arith.index_cast %c13_i32 : i32 to index
    %c0_47 = arith.constant 0 : index
    %216 = vector.load %arg2[%215, %c0_47] : memref<32x64xf32, #tpu.memory_space<vmem>>, vector<1x64xf32>
    %217 = arith.subf %214, %213 : vector<1x64xf32>
    %218 = arith.mulf %3, %217 : vector<1x64xf32>
    %219 = arith.addf %213, %218 : vector<1x64xf32>
    %220 = arith.mulf %4, %214 : vector<1x64xf32>
    %221 = arith.subf %214, %220 : vector<1x64xf32>
    %cst_48 = arith.constant 1.000000e+00 : f32
    %222 = vector.broadcast %cst_48 : f32 to vector<1x64xf32>
    %223 = arith.cmpf ogt, %219, %222 : vector<1x64xf32>
    %224 = arith.extui %223 : vector<1x64xi1> to vector<1x64xi32>
    %225 = arith.sitofp %224 : vector<1x64xi32> to vector<1x64xf32>
    %226 = arith.index_cast %c13_i32 : i32 to index
    %c0_49 = arith.constant 0 : index
    %227 = vector.load %arg5[%226, %c0_49] : memref<32x64xf32, #tpu.memory_space<vmem>>, vector<1x64xf32>
    tpu.vector_store %arg5[%226, %c0_49], %225 {strides = array<i32>} : memref<32x64xf32, #tpu.memory_space<vmem>>, vector<1x64xf32>,
    %228 = arith.mulf %225, %219 : vector<1x64xf32>
    %229 = arith.subf %219, %228 : vector<1x64xf32>
    %230 = arith.addf %221, %216 : vector<1x64xf32>
    %c14_i32 = arith.constant 14 : i32
    %231 = arith.index_cast %c14_i32 : i32 to index
    %c0_50 = arith.constant 0 : index
    %232 = vector.load %arg2[%231, %c0_50] : memref<32x64xf32, #tpu.memory_space<vmem>>, vector<1x64xf32>
    %233 = arith.subf %230, %229 : vector<1x64xf32>
    %234 = arith.mulf %3, %233 : vector<1x64xf32>
    %235 = arith.addf %229, %234 : vector<1x64xf32>
    %236 = arith.mulf %4, %230 : vector<1x64xf32>
    %237 = arith.subf %230, %236 : vector<1x64xf32>
    %cst_51 = arith.constant 1.000000e+00 : f32
    %238 = vector.broadcast %cst_51 : f32 to vector<1x64xf32>
    %239 = arith.cmpf ogt, %235, %238 : vector<1x64xf32>
    %240 = arith.extui %239 : vector<1x64xi1> to vector<1x64xi32>
    %241 = arith.sitofp %240 : vector<1x64xi32> to vector<1x64xf32>
    %242 = arith.index_cast %c14_i32 : i32 to index
    %c0_52 = arith.constant 0 : index
    %243 = vector.load %arg5[%242, %c0_52] : memref<32x64xf32, #tpu.memory_space<vmem>>, vector<1x64xf32>
    tpu.vector_store %arg5[%242, %c0_52], %241 {strides = array<i32>} : memref<32x64xf32, #tpu.memory_space<vmem>>, vector<1x64xf32>,
    %244 = arith.mulf %241, %235 : vector<1x64xf32>
    %245 = arith.subf %235, %244 : vector<1x64xf32>
    %246 = arith.addf %237, %232 : vector<1x64xf32>
    %c15_i32 = arith.constant 15 : i32
    %247 = arith.index_cast %c15_i32 : i32 to index
    %c0_53 = arith.constant 0 : index
    %248 = vector.load %arg2[%247, %c0_53] : memref<32x64xf32, #tpu.memory_space<vmem>>, vector<1x64xf32>
    %249 = arith.subf %246, %245 : vector<1x64xf32>
    %250 = arith.mulf %3, %249 : vector<1x64xf32>
    %251 = arith.addf %245, %250 : vector<1x64xf32>
    %252 = arith.mulf %4, %246 : vector<1x64xf32>
    %253 = arith.subf %246, %252 : vector<1x64xf32>
    %cst_54 = arith.constant 1.000000e+00 : f32
    %254 = vector.broadcast %cst_54 : f32 to vector<1x64xf32>
    %255 = arith.cmpf ogt, %251, %254 : vector<1x64xf32>
    %256 = arith.extui %255 : vector<1x64xi1> to vector<1x64xi32>
    %257 = arith.sitofp %256 : vector<1x64xi32> to vector<1x64xf32>
    %258 = arith.index_cast %c15_i32 : i32 to index
    %c0_55 = arith.constant 0 : index
    %259 = vector.load %arg5[%258, %c0_55] : memref<32x64xf32, #tpu.memory_space<vmem>>, vector<1x64xf32>
    tpu.vector_store %arg5[%258, %c0_55], %257 {strides = array<i32>} : memref<32x64xf32, #tpu.memory_space<vmem>>, vector<1x64xf32>,
    %260 = arith.mulf %257, %251 : vector<1x64xf32>
    %261 = arith.subf %251, %260 : vector<1x64xf32>
    %262 = arith.addf %253, %248 : vector<1x64xf32>
    %c16_i32 = arith.constant 16 : i32
    %263 = arith.index_cast %c16_i32 : i32 to index
    %c0_56 = arith.constant 0 : index
    %264 = vector.load %arg2[%263, %c0_56] : memref<32x64xf32, #tpu.memory_space<vmem>>, vector<1x64xf32>
    %265 = arith.subf %262, %261 : vector<1x64xf32>
    %266 = arith.mulf %3, %265 : vector<1x64xf32>
    %267 = arith.addf %261, %266 : vector<1x64xf32>
    %268 = arith.mulf %4, %262 : vector<1x64xf32>
    %269 = arith.subf %262, %268 : vector<1x64xf32>
    %cst_57 = arith.constant 1.000000e+00 : f32
    %270 = vector.broadcast %cst_57 : f32 to vector<1x64xf32>
    %271 = arith.cmpf ogt, %267, %270 : vector<1x64xf32>
    %272 = arith.extui %271 : vector<1x64xi1> to vector<1x64xi32>
    %273 = arith.sitofp %272 : vector<1x64xi32> to vector<1x64xf32>
    %274 = arith.index_cast %c16_i32 : i32 to index
    %c0_58 = arith.constant 0 : index
    %275 = vector.load %arg5[%274, %c0_58] : memref<32x64xf32, #tpu.memory_space<vmem>>, vector<1x64xf32>
    tpu.vector_store %arg5[%274, %c0_58], %273 {strides = array<i32>} : memref<32x64xf32, #tpu.memory_space<vmem>>, vector<1x64xf32>,
    %276 = arith.mulf %273, %267 : vector<1x64xf32>
    %277 = arith.subf %267, %276 : vector<1x64xf32>
    %278 = arith.addf %269, %264 : vector<1x64xf32>
    %c17_i32 = arith.constant 17 : i32
    %279 = arith.index_cast %c17_i32 : i32 to index
    %c0_59 = arith.constant 0 : index
    %280 = vector.load %arg2[%279, %c0_59] : memref<32x64xf32, #tpu.memory_space<vmem>>, vector<1x64xf32>
    %281 = arith.subf %278, %277 : vector<1x64xf32>
    %282 = arith.mulf %3, %281 : vector<1x64xf32>
    %283 = arith.addf %277, %282 : vector<1x64xf32>
    %284 = arith.mulf %4, %278 : vector<1x64xf32>
    %285 = arith.subf %278, %284 : vector<1x64xf32>
    %cst_60 = arith.constant 1.000000e+00 : f32
    %286 = vector.broadcast %cst_60 : f32 to vector<1x64xf32>
    %287 = arith.cmpf ogt, %283, %286 : vector<1x64xf32>
    %288 = arith.extui %287 : vector<1x64xi1> to vector<1x64xi32>
    %289 = arith.sitofp %288 : vector<1x64xi32> to vector<1x64xf32>
    %290 = arith.index_cast %c17_i32 : i32 to index
    %c0_61 = arith.constant 0 : index
    %291 = vector.load %arg5[%290, %c0_61] : memref<32x64xf32, #tpu.memory_space<vmem>>, vector<1x64xf32>
    tpu.vector_store %arg5[%290, %c0_61], %289 {strides = array<i32>} : memref<32x64xf32, #tpu.memory_space<vmem>>, vector<1x64xf32>,
    %292 = arith.mulf %289, %283 : vector<1x64xf32>
    %293 = arith.subf %283, %292 : vector<1x64xf32>
    %294 = arith.addf %285, %280 : vector<1x64xf32>
    %c18_i32 = arith.constant 18 : i32
    %295 = arith.index_cast %c18_i32 : i32 to index
    %c0_62 = arith.constant 0 : index
    %296 = vector.load %arg2[%295, %c0_62] : memref<32x64xf32, #tpu.memory_space<vmem>>, vector<1x64xf32>
    %297 = arith.subf %294, %293 : vector<1x64xf32>
    %298 = arith.mulf %3, %297 : vector<1x64xf32>
    %299 = arith.addf %293, %298 : vector<1x64xf32>
    %300 = arith.mulf %4, %294 : vector<1x64xf32>
    %301 = arith.subf %294, %300 : vector<1x64xf32>
    %cst_63 = arith.constant 1.000000e+00 : f32
    %302 = vector.broadcast %cst_63 : f32 to vector<1x64xf32>
    %303 = arith.cmpf ogt, %299, %302 : vector<1x64xf32>
    %304 = arith.extui %303 : vector<1x64xi1> to vector<1x64xi32>
    %305 = arith.sitofp %304 : vector<1x64xi32> to vector<1x64xf32>
    %306 = arith.index_cast %c18_i32 : i32 to index
    %c0_64 = arith.constant 0 : index
    %307 = vector.load %arg5[%306, %c0_64] : memref<32x64xf32, #tpu.memory_space<vmem>>, vector<1x64xf32>
    tpu.vector_store %arg5[%306, %c0_64], %305 {strides = array<i32>} : memref<32x64xf32, #tpu.memory_space<vmem>>, vector<1x64xf32>,
    %308 = arith.mulf %305, %299 : vector<1x64xf32>
    %309 = arith.subf %299, %308 : vector<1x64xf32>
    %310 = arith.addf %301, %296 : vector<1x64xf32>
    %c19_i32 = arith.constant 19 : i32
    %311 = arith.index_cast %c19_i32 : i32 to index
    %c0_65 = arith.constant 0 : index
    %312 = vector.load %arg2[%311, %c0_65] : memref<32x64xf32, #tpu.memory_space<vmem>>, vector<1x64xf32>
    %313 = arith.subf %310, %309 : vector<1x64xf32>
    %314 = arith.mulf %3, %313 : vector<1x64xf32>
    %315 = arith.addf %309, %314 : vector<1x64xf32>
    %316 = arith.mulf %4, %310 : vector<1x64xf32>
    %317 = arith.subf %310, %316 : vector<1x64xf32>
    %cst_66 = arith.constant 1.000000e+00 : f32
    %318 = vector.broadcast %cst_66 : f32 to vector<1x64xf32>
    %319 = arith.cmpf ogt, %315, %318 : vector<1x64xf32>
    %320 = arith.extui %319 : vector<1x64xi1> to vector<1x64xi32>
    %321 = arith.sitofp %320 : vector<1x64xi32> to vector<1x64xf32>
    %322 = arith.index_cast %c19_i32 : i32 to index
    %c0_67 = arith.constant 0 : index
    %323 = vector.load %arg5[%322, %c0_67] : memref<32x64xf32, #tpu.memory_space<vmem>>, vector<1x64xf32>
    tpu.vector_store %arg5[%322, %c0_67], %321 {strides = array<i32>} : memref<32x64xf32, #tpu.memory_space<vmem>>, vector<1x64xf32>,
    %324 = arith.mulf %321, %315 : vector<1x64xf32>
    %325 = arith.subf %315, %324 : vector<1x64xf32>
    %326 = arith.addf %317, %312 : vector<1x64xf32>
    %c20_i32 = arith.constant 20 : i32
    %327 = arith.index_cast %c20_i32 : i32 to index
    %c0_68 = arith.constant 0 : index
    %328 = vector.load %arg2[%327, %c0_68] : memref<32x64xf32, #tpu.memory_space<vmem>>, vector<1x64xf32>
    %329 = arith.subf %326, %325 : vector<1x64xf32>
    %330 = arith.mulf %3, %329 : vector<1x64xf32>
    %331 = arith.addf %325, %330 : vector<1x64xf32>
    %332 = arith.mulf %4, %326 : vector<1x64xf32>
    %333 = arith.subf %326, %332 : vector<1x64xf32>
    %cst_69 = arith.constant 1.000000e+00 : f32
    %334 = vector.broadcast %cst_69 : f32 to vector<1x64xf32>
    %335 = arith.cmpf ogt, %331, %334 : vector<1x64xf32>
    %336 = arith.extui %335 : vector<1x64xi1> to vector<1x64xi32>
    %337 = arith.sitofp %336 : vector<1x64xi32> to vector<1x64xf32>
    %338 = arith.index_cast %c20_i32 : i32 to index
    %c0_70 = arith.constant 0 : index
    %339 = vector.load %arg5[%338, %c0_70] : memref<32x64xf32, #tpu.memory_space<vmem>>, vector<1x64xf32>
    tpu.vector_store %arg5[%338, %c0_70], %337 {strides = array<i32>} : memref<32x64xf32, #tpu.memory_space<vmem>>, vector<1x64xf32>,
    %340 = arith.mulf %337, %331 : vector<1x64xf32>
    %341 = arith.subf %331, %340 : vector<1x64xf32>
    %342 = arith.addf %333, %328 : vector<1x64xf32>
    %c21_i32 = arith.constant 21 : i32
    %343 = arith.index_cast %c21_i32 : i32 to index
    %c0_71 = arith.constant 0 : index
    %344 = vector.load %arg2[%343, %c0_71] : memref<32x64xf32, #tpu.memory_space<vmem>>, vector<1x64xf32>
    %345 = arith.subf %342, %341 : vector<1x64xf32>
    %346 = arith.mulf %3, %345 : vector<1x64xf32>
    %347 = arith.addf %341, %346 : vector<1x64xf32>
    %348 = arith.mulf %4, %342 : vector<1x64xf32>
    %349 = arith.subf %342, %348 : vector<1x64xf32>
    %cst_72 = arith.constant 1.000000e+00 : f32
    %350 = vector.broadcast %cst_72 : f32 to vector<1x64xf32>
    %351 = arith.cmpf ogt, %347, %350 : vector<1x64xf32>
    %352 = arith.extui %351 : vector<1x64xi1> to vector<1x64xi32>
    %353 = arith.sitofp %352 : vector<1x64xi32> to vector<1x64xf32>
    %354 = arith.index_cast %c21_i32 : i32 to index
    %c0_73 = arith.constant 0 : index
    %355 = vector.load %arg5[%354, %c0_73] : memref<32x64xf32, #tpu.memory_space<vmem>>, vector<1x64xf32>
    tpu.vector_store %arg5[%354, %c0_73], %353 {strides = array<i32>} : memref<32x64xf32, #tpu.memory_space<vmem>>, vector<1x64xf32>,
    %356 = arith.mulf %353, %347 : vector<1x64xf32>
    %357 = arith.subf %347, %356 : vector<1x64xf32>
    %358 = arith.addf %349, %344 : vector<1x64xf32>
    %c22_i32 = arith.constant 22 : i32
    %359 = arith.index_cast %c22_i32 : i32 to index
    %c0_74 = arith.constant 0 : index
    %360 = vector.load %arg2[%359, %c0_74] : memref<32x64xf32, #tpu.memory_space<vmem>>, vector<1x64xf32>
    %361 = arith.subf %358, %357 : vector<1x64xf32>
    %362 = arith.mulf %3, %361 : vector<1x64xf32>
    %363 = arith.addf %357, %362 : vector<1x64xf32>
    %364 = arith.mulf %4, %358 : vector<1x64xf32>
    %365 = arith.subf %358, %364 : vector<1x64xf32>
    %cst_75 = arith.constant 1.000000e+00 : f32
    %366 = vector.broadcast %cst_75 : f32 to vector<1x64xf32>
    %367 = arith.cmpf ogt, %363, %366 : vector<1x64xf32>
    %368 = arith.extui %367 : vector<1x64xi1> to vector<1x64xi32>
    %369 = arith.sitofp %368 : vector<1x64xi32> to vector<1x64xf32>
    %370 = arith.index_cast %c22_i32 : i32 to index
    %c0_76 = arith.constant 0 : index
    %371 = vector.load %arg5[%370, %c0_76] : memref<32x64xf32, #tpu.memory_space<vmem>>, vector<1x64xf32>
    tpu.vector_store %arg5[%370, %c0_76], %369 {strides = array<i32>} : memref<32x64xf32, #tpu.memory_space<vmem>>, vector<1x64xf32>,
    %372 = arith.mulf %369, %363 : vector<1x64xf32>
    %373 = arith.subf %363, %372 : vector<1x64xf32>
    %374 = arith.addf %365, %360 : vector<1x64xf32>
    %c23_i32 = arith.constant 23 : i32
    %375 = arith.index_cast %c23_i32 : i32 to index
    %c0_77 = arith.constant 0 : index
    %376 = vector.load %arg2[%375, %c0_77] : memref<32x64xf32, #tpu.memory_space<vmem>>, vector<1x64xf32>
    %377 = arith.subf %374, %373 : vector<1x64xf32>
    %378 = arith.mulf %3, %377 : vector<1x64xf32>
    %379 = arith.addf %373, %378 : vector<1x64xf32>
    %380 = arith.mulf %4, %374 : vector<1x64xf32>
    %381 = arith.subf %374, %380 : vector<1x64xf32>
    %cst_78 = arith.constant 1.000000e+00 : f32
    %382 = vector.broadcast %cst_78 : f32 to vector<1x64xf32>
    %383 = arith.cmpf ogt, %379, %382 : vector<1x64xf32>
    %384 = arith.extui %383 : vector<1x64xi1> to vector<1x64xi32>
    %385 = arith.sitofp %384 : vector<1x64xi32> to vector<1x64xf32>
    %386 = arith.index_cast %c23_i32 : i32 to index
    %c0_79 = arith.constant 0 : index
    %387 = vector.load %arg5[%386, %c0_79] : memref<32x64xf32, #tpu.memory_space<vmem>>, vector<1x64xf32>
    tpu.vector_store %arg5[%386, %c0_79], %385 {strides = array<i32>} : memref<32x64xf32, #tpu.memory_space<vmem>>, vector<1x64xf32>,
    %388 = arith.mulf %385, %379 : vector<1x64xf32>
    %389 = arith.subf %379, %388 : vector<1x64xf32>
    %390 = arith.addf %381, %376 : vector<1x64xf32>
    %c24_i32 = arith.constant 24 : i32
    %391 = arith.index_cast %c24_i32 : i32 to index
    %c0_80 = arith.constant 0 : index
    %392 = vector.load %arg2[%391, %c0_80] : memref<32x64xf32, #tpu.memory_space<vmem>>, vector<1x64xf32>
    %393 = arith.subf %390, %389 : vector<1x64xf32>
    %394 = arith.mulf %3, %393 : vector<1x64xf32>
    %395 = arith.addf %389, %394 : vector<1x64xf32>
    %396 = arith.mulf %4, %390 : vector<1x64xf32>
    %397 = arith.subf %390, %396 : vector<1x64xf32>
    %cst_81 = arith.constant 1.000000e+00 : f32
    %398 = vector.broadcast %cst_81 : f32 to vector<1x64xf32>
    %399 = arith.cmpf ogt, %395, %398 : vector<1x64xf32>
    %400 = arith.extui %399 : vector<1x64xi1> to vector<1x64xi32>
    %401 = arith.sitofp %400 : vector<1x64xi32> to vector<1x64xf32>
    %402 = arith.index_cast %c24_i32 : i32 to index
    %c0_82 = arith.constant 0 : index
    %403 = vector.load %arg5[%402, %c0_82] : memref<32x64xf32, #tpu.memory_space<vmem>>, vector<1x64xf32>
    tpu.vector_store %arg5[%402, %c0_82], %401 {strides = array<i32>} : memref<32x64xf32, #tpu.memory_space<vmem>>, vector<1x64xf32>,
    %404 = arith.mulf %401, %395 : vector<1x64xf32>
    %405 = arith.subf %395, %404 : vector<1x64xf32>
    %406 = arith.addf %397, %392 : vector<1x64xf32>
    %c25_i32 = arith.constant 25 : i32
    %407 = arith.index_cast %c25_i32 : i32 to index
    %c0_83 = arith.constant 0 : index
    %408 = vector.load %arg2[%407, %c0_83] : memref<32x64xf32, #tpu.memory_space<vmem>>, vector<1x64xf32>
    %409 = arith.subf %406, %405 : vector<1x64xf32>
    %410 = arith.mulf %3, %409 : vector<1x64xf32>
    %411 = arith.addf %405, %410 : vector<1x64xf32>
    %412 = arith.mulf %4, %406 : vector<1x64xf32>
    %413 = arith.subf %406, %412 : vector<1x64xf32>
    %cst_84 = arith.constant 1.000000e+00 : f32
    %414 = vector.broadcast %cst_84 : f32 to vector<1x64xf32>
    %415 = arith.cmpf ogt, %411, %414 : vector<1x64xf32>
    %416 = arith.extui %415 : vector<1x64xi1> to vector<1x64xi32>
    %417 = arith.sitofp %416 : vector<1x64xi32> to vector<1x64xf32>
    %418 = arith.index_cast %c25_i32 : i32 to index
    %c0_85 = arith.constant 0 : index
    %419 = vector.load %arg5[%418, %c0_85] : memref<32x64xf32, #tpu.memory_space<vmem>>, vector<1x64xf32>
    tpu.vector_store %arg5[%418, %c0_85], %417 {strides = array<i32>} : memref<32x64xf32, #tpu.memory_space<vmem>>, vector<1x64xf32>,
    %420 = arith.mulf %417, %411 : vector<1x64xf32>
    %421 = arith.subf %411, %420 : vector<1x64xf32>
    %422 = arith.addf %413, %408 : vector<1x64xf32>
    %c26_i32 = arith.constant 26 : i32
    %423 = arith.index_cast %c26_i32 : i32 to index
    %c0_86 = arith.constant 0 : index
    %424 = vector.load %arg2[%423, %c0_86] : memref<32x64xf32, #tpu.memory_space<vmem>>, vector<1x64xf32>
    %425 = arith.subf %422, %421 : vector<1x64xf32>
    %426 = arith.mulf %3, %425 : vector<1x64xf32>
    %427 = arith.addf %421, %426 : vector<1x64xf32>
    %428 = arith.mulf %4, %422 : vector<1x64xf32>
    %429 = arith.subf %422, %428 : vector<1x64xf32>
    %cst_87 = arith.constant 1.000000e+00 : f32
    %430 = vector.broadcast %cst_87 : f32 to vector<1x64xf32>
    %431 = arith.cmpf ogt, %427, %430 : vector<1x64xf32>
    %432 = arith.extui %431 : vector<1x64xi1> to vector<1x64xi32>
    %433 = arith.sitofp %432 : vector<1x64xi32> to vector<1x64xf32>
    %434 = arith.index_cast %c26_i32 : i32 to index
    %c0_88 = arith.constant 0 : index
    %435 = vector.load %arg5[%434, %c0_88] : memref<32x64xf32, #tpu.memory_space<vmem>>, vector<1x64xf32>
    tpu.vector_store %arg5[%434, %c0_88], %433 {strides = array<i32>} : memref<32x64xf32, #tpu.memory_space<vmem>>, vector<1x64xf32>,
    %436 = arith.mulf %433, %427 : vector<1x64xf32>
    %437 = arith.subf %427, %436 : vector<1x64xf32>
    %438 = arith.addf %429, %424 : vector<1x64xf32>
    %c27_i32 = arith.constant 27 : i32
    %439 = arith.index_cast %c27_i32 : i32 to index
    %c0_89 = arith.constant 0 : index
    %440 = vector.load %arg2[%439, %c0_89] : memref<32x64xf32, #tpu.memory_space<vmem>>, vector<1x64xf32>
    %441 = arith.subf %438, %437 : vector<1x64xf32>
    %442 = arith.mulf %3, %441 : vector<1x64xf32>
    %443 = arith.addf %437, %442 : vector<1x64xf32>
    %444 = arith.mulf %4, %438 : vector<1x64xf32>
    %445 = arith.subf %438, %444 : vector<1x64xf32>
    %cst_90 = arith.constant 1.000000e+00 : f32
    %446 = vector.broadcast %cst_90 : f32 to vector<1x64xf32>
    %447 = arith.cmpf ogt, %443, %446 : vector<1x64xf32>
    %448 = arith.extui %447 : vector<1x64xi1> to vector<1x64xi32>
    %449 = arith.sitofp %448 : vector<1x64xi32> to vector<1x64xf32>
    %450 = arith.index_cast %c27_i32 : i32 to index
    %c0_91 = arith.constant 0 : index
    %451 = vector.load %arg5[%450, %c0_91] : memref<32x64xf32, #tpu.memory_space<vmem>>, vector<1x64xf32>
    tpu.vector_store %arg5[%450, %c0_91], %449 {strides = array<i32>} : memref<32x64xf32, #tpu.memory_space<vmem>>, vector<1x64xf32>,
    %452 = arith.mulf %449, %443 : vector<1x64xf32>
    %453 = arith.subf %443, %452 : vector<1x64xf32>
    %454 = arith.addf %445, %440 : vector<1x64xf32>
    %c28_i32 = arith.constant 28 : i32
    %455 = arith.index_cast %c28_i32 : i32 to index
    %c0_92 = arith.constant 0 : index
    %456 = vector.load %arg2[%455, %c0_92] : memref<32x64xf32, #tpu.memory_space<vmem>>, vector<1x64xf32>
    %457 = arith.subf %454, %453 : vector<1x64xf32>
    %458 = arith.mulf %3, %457 : vector<1x64xf32>
    %459 = arith.addf %453, %458 : vector<1x64xf32>
    %460 = arith.mulf %4, %454 : vector<1x64xf32>
    %461 = arith.subf %454, %460 : vector<1x64xf32>
    %cst_93 = arith.constant 1.000000e+00 : f32
    %462 = vector.broadcast %cst_93 : f32 to vector<1x64xf32>
    %463 = arith.cmpf ogt, %459, %462 : vector<1x64xf32>
    %464 = arith.extui %463 : vector<1x64xi1> to vector<1x64xi32>
    %465 = arith.sitofp %464 : vector<1x64xi32> to vector<1x64xf32>
    %466 = arith.index_cast %c28_i32 : i32 to index
    %c0_94 = arith.constant 0 : index
    %467 = vector.load %arg5[%466, %c0_94] : memref<32x64xf32, #tpu.memory_space<vmem>>, vector<1x64xf32>
    tpu.vector_store %arg5[%466, %c0_94], %465 {strides = array<i32>} : memref<32x64xf32, #tpu.memory_space<vmem>>, vector<1x64xf32>,
    %468 = arith.mulf %465, %459 : vector<1x64xf32>
    %469 = arith.subf %459, %468 : vector<1x64xf32>
    %470 = arith.addf %461, %456 : vector<1x64xf32>
    %c29_i32 = arith.constant 29 : i32
    %471 = arith.index_cast %c29_i32 : i32 to index
    %c0_95 = arith.constant 0 : index
    %472 = vector.load %arg2[%471, %c0_95] : memref<32x64xf32, #tpu.memory_space<vmem>>, vector<1x64xf32>
    %473 = arith.subf %470, %469 : vector<1x64xf32>
    %474 = arith.mulf %3, %473 : vector<1x64xf32>
    %475 = arith.addf %469, %474 : vector<1x64xf32>
    %476 = arith.mulf %4, %470 : vector<1x64xf32>
    %477 = arith.subf %470, %476 : vector<1x64xf32>
    %cst_96 = arith.constant 1.000000e+00 : f32
    %478 = vector.broadcast %cst_96 : f32 to vector<1x64xf32>
    %479 = arith.cmpf ogt, %475, %478 : vector<1x64xf32>
    %480 = arith.extui %479 : vector<1x64xi1> to vector<1x64xi32>
    %481 = arith.sitofp %480 : vector<1x64xi32> to vector<1x64xf32>
    %482 = arith.index_cast %c29_i32 : i32 to index
    %c0_97 = arith.constant 0 : index
    %483 = vector.load %arg5[%482, %c0_97] : memref<32x64xf32, #tpu.memory_space<vmem>>, vector<1x64xf32>
    tpu.vector_store %arg5[%482, %c0_97], %481 {strides = array<i32>} : memref<32x64xf32, #tpu.memory_space<vmem>>, vector<1x64xf32>,
    %484 = arith.mulf %481, %475 : vector<1x64xf32>
    %485 = arith.subf %475, %484 : vector<1x64xf32>
    %486 = arith.addf %477, %472 : vector<1x64xf32>
    %c30_i32 = arith.constant 30 : i32
    %487 = arith.index_cast %c30_i32 : i32 to index
    %c0_98 = arith.constant 0 : index
    %488 = vector.load %arg2[%487, %c0_98] : memref<32x64xf32, #tpu.memory_space<vmem>>, vector<1x64xf32>
    %489 = arith.subf %486, %485 : vector<1x64xf32>
    %490 = arith.mulf %3, %489 : vector<1x64xf32>
    %491 = arith.addf %485, %490 : vector<1x64xf32>
    %492 = arith.mulf %4, %486 : vector<1x64xf32>
    %493 = arith.subf %486, %492 : vector<1x64xf32>
    %cst_99 = arith.constant 1.000000e+00 : f32
    %494 = vector.broadcast %cst_99 : f32 to vector<1x64xf32>
    %495 = arith.cmpf ogt, %491, %494 : vector<1x64xf32>
    %496 = arith.extui %495 : vector<1x64xi1> to vector<1x64xi32>
    %497 = arith.sitofp %496 : vector<1x64xi32> to vector<1x64xf32>
    %498 = arith.index_cast %c30_i32 : i32 to index
    %c0_100 = arith.constant 0 : index
    %499 = vector.load %arg5[%498, %c0_100] : memref<32x64xf32, #tpu.memory_space<vmem>>, vector<1x64xf32>
    tpu.vector_store %arg5[%498, %c0_100], %497 {strides = array<i32>} : memref<32x64xf32, #tpu.memory_space<vmem>>, vector<1x64xf32>,
    %500 = arith.mulf %497, %491 : vector<1x64xf32>
    %501 = arith.subf %491, %500 : vector<1x64xf32>
    %502 = arith.addf %493, %488 : vector<1x64xf32>
    %c31_i32 = arith.constant 31 : i32
    %503 = arith.index_cast %c31_i32 : i32 to index
    %c0_101 = arith.constant 0 : index
    %504 = vector.load %arg2[%503, %c0_101] : memref<32x64xf32, #tpu.memory_space<vmem>>, vector<1x64xf32>
    %505 = arith.subf %502, %501 : vector<1x64xf32>
    %506 = arith.mulf %3, %505 : vector<1x64xf32>
    %507 = arith.addf %501, %506 : vector<1x64xf32>
    %508 = arith.mulf %4, %502 : vector<1x64xf32>
    %509 = arith.subf %502, %508 : vector<1x64xf32>
    %cst_102 = arith.constant 1.000000e+00 : f32
    %510 = vector.broadcast %cst_102 : f32 to vector<1x64xf32>
    %511 = arith.cmpf ogt, %507, %510 : vector<1x64xf32>
    %512 = arith.extui %511 : vector<1x64xi1> to vector<1x64xi32>
    %513 = arith.sitofp %512 : vector<1x64xi32> to vector<1x64xf32>
    %514 = arith.index_cast %c31_i32 : i32 to index
    %c0_103 = arith.constant 0 : index
    %515 = vector.load %arg5[%514, %c0_103] : memref<32x64xf32, #tpu.memory_space<vmem>>, vector<1x64xf32>
    tpu.vector_store %arg5[%514, %c0_103], %513 {strides = array<i32>} : memref<32x64xf32, #tpu.memory_space<vmem>>, vector<1x64xf32>,
    %516 = arith.mulf %513, %507 : vector<1x64xf32>
    %517 = arith.subf %507, %516 : vector<1x64xf32>
    %518 = arith.addf %509, %504 : vector<1x64xf32>
    %c32_i32 = arith.constant 32 : i32
    %c0_104 = arith.constant 0 : index
    %c0_105 = arith.constant 0 : index
    %519 = vector.load %arg6[%c0_104, %c0_105] : memref<1x64xf32, #tpu.memory_space<vmem>>, vector<1x64xf32>
    tpu.vector_store %arg6[%c0_104, %c0_105], %517 {strides = array<i32>} : memref<1x64xf32, #tpu.memory_space<vmem>>, vector<1x64xf32>,
    %c0_106 = arith.constant 0 : index
    %c0_107 = arith.constant 0 : index
    %520 = vector.load %arg7[%c0_106, %c0_107] : memref<1x64xf32, #tpu.memory_space<vmem>>, vector<1x64xf32>
    tpu.vector_store %arg7[%c0_106, %c0_107], %518 {strides = array<i32>} : memref<1x64xf32, #tpu.memory_space<vmem>>, vector<1x64xf32>,
    return
  }
  func.func @transform_0(%arg0: i32, %arg1: i32) -> (i32, i32) {
    %c0_i32 = arith.constant 0 : i32
    return %arg1, %arg0 : i32, i32
  }
  func.func @transform_1(%arg0: i32, %arg1: i32) -> (i32, i32) {
    %c0_i32 = arith.constant 0 : i32
    %c0_i32_0 = arith.constant 0 : i32
    return %c0_i32, %arg0 : i32, i32
  }
  func.func @transform_2(%arg0: i32, %arg1: i32) -> (i32, i32) {
    %c0_i32 = arith.constant 0 : i32
    %c0_i32_0 = arith.constant 0 : i32
    return %c0_i32, %arg0 : i32, i32
  }
  func.func @transform_3(%arg0: i32, %arg1: i32) -> (i32, i32) {
    %c0_i32 = arith.constant 0 : i32
    return %arg1, %arg0 : i32, i32
  }
  func.func @transform_4(%arg0: i32, %arg1: i32) -> (i32, i32) {
    %c0_i32 = arith.constant 0 : i32
    %c0_i32_0 = arith.constant 0 : i32
    return %c0_i32, %arg0 : i32, i32
  }
  func.func @transform_5(%arg0: i32, %arg1: i32) -> (i32, i32) {
    %c0_i32 = arith.constant 0 : i32
    %c0_i32_0 = arith.constant 0 : i32
    return %c0_i32, %arg0 : i32, i32
  }
}

</mosaic_0001>

<bundles_post_ra>
// kernel: tpu_custom_call.1
= control target key start
LH: loop header
LB: loop body
LE: loop exit
PB: predicated region body
PF: predicated region fallthrough
CT: control target
= control target key end

     0   :  { %11 = vsyncpa [#allocation3], 0  ;;  %s1003_s0 = inlined_call_operand.hbm [shape: f32[32,64], index: 0, kind: input, shape index: {}]   ;;  %s1004_s1 = inlined_call_operand.vmem [shape: f32[1,64], index: 1, kind: input, shape index: {}]   ;;  %s1005_s2 = inlined_call_operand.vmem [shape: f32[1,64], index: 2, kind: input, shape index: {}]   ;;  %s1006_s3 = inlined_call_operand.hbm [shape: f32[32,64], index: 3, kind: output, shape index: {0}]   ;;  %s1007_s4 = inlined_call_operand.hbm [shape: f32[1,64], index: 4, kind: output, shape index: {1}]   ;;  %s1008_s5 = inlined_call_operand.hbm [shape: f32[1,64], index: 5, kind: output, shape index: {2}]  }
   0x1   :  { %12 = vsyncpa [#allocation4], 0 }
   0x2   :  { %13 = vsyncpa [#allocation7], 0  ;;  %s640_s18 = smov [#allocation2]   ;;  %s546_s22 = scalar_lea.hbm %s1003_s0, 512 }
   0x3   :  { %s19_s19 = sshll.u32 %s640_s18, 4  ;;  %p547_p0 = scmp.ne.s32.totalorder %s1003_s0, %s546_s22  ;;  %s20_s19 = int_to_ptr.vmem [resolvable:$true] %s19_s19 }
   0x4   :  { %p550_p1 = scmp.lt.u32.totalorder %s546_s22, %s1003_s0 }
   0x6   :  { %p552_p2 = pnand %p550_p1, %p547_p0 }
   0x8   :  { %555 = shalt.err (!%p552_p2)
}
   0x9   :  { %s556_s27 = scalar_lea.vmem %s20_s19, 512  ;;  %p561_p4 = scmp.lt.s32.totalorder %s20_s19, %s20_s19 }
   0xa   :  { %p557_p3 = scmp.ne.s32.totalorder %s20_s19, %s556_s27  ;;  %p562_p5 = scmp.lt.s32.totalorder %s556_s27, %s556_s27 }
   0xc   :  { %p563_p6 = por %p562_p5, %p561_p4 }
   0xe   :  { %p564_p7 = pnand %p563_p6, %p557_p3 }
  0x10   :  { %567 = shalt.err (!%p564_p7)
}
  0x11   :  { %s641_s28 = smov 128   ;;  %s642_s29 = smov 8  }
  0x12   :  { %25 = dma.hbm_to_vmem [thread:$0]  %s1003_s0, 512, %s20_s19, [#allocation3], %s641_s28, %s641_s28, %s642_s29  }
  0x13   :  { %634 = dma.done.wait [#allocation3], 512  }
  0x14   :  { %635 = vsyncadd [#allocation3], 4294966784  ;;  %vm37_vm0 = vcmask 516096   ;;  %v643_v0 = vmov 0.0   ;;  %v699_v1 = vld [vmem:[%s1005_s2] sm:$0x1] }
  0x15   :  { %38 = vst.msk [vmem:[#allocation6] sm:$0x1] %vm37_vm0, %v643_v0  ;;  %39 = vst.msk [vmem:[#allocation8] sm:$0x1] %vm37_vm0, %v643_v0  ;;  %v704_v2 = vld [vmem:[%s1004_s1] sm:$0x1] }
  0x16   :  { %v44_v7 = vld [vmem:[#allocation2] sm:$0x1]  ;;  %v58_v14 = vld [vmem:[#allocation2 + $0x1] sm:$0x1]  ;;  %v71_v21 = vld [vmem:[#allocation2 + $0x2] sm:$0x1] }
  0x17   :  { %v84_v28 = vld [vmem:[#allocation2 + $0x3] sm:$0x1]  ;;  %v97_v35 = vld [vmem:[#allocation2 + $0x4] sm:$0x1]  ;;  %v110_v42 = vld [vmem:[#allocation2 + $0x5] sm:$0x1] }
  0x18   :  { %v123_v49 = vld [vmem:[#allocation2 + $0x6] sm:$0x1]  ;;  %v136_v56 = vld [vmem:[#allocation2 + $0x7] sm:$0x1]  ;;  %v149_v63 = vld [vmem:[#allocation2 + $0x8] sm:$0x1] }
  0x19   :  { %s644_s0 = smov [#allocation5]   ;;  %s645_s2 = smov [#allocation6]  }
  0x1a   :  { %s468_s1 = sshll.u32 %s644_s0, 4  ;;  %s481_s11 = sshll.u32 %s645_s2, 4  ;;  %s469_s1 = int_to_ptr.vmem [resolvable:$true] %s468_s1  ;;  %s482_s11 = int_to_ptr.vmem [resolvable:$true] %s481_s11 }
  0x1b   :  { %s646_s12 = smov [#allocation8]   ;;  %s568_s14 = scalar_lea.vmem %s469_s1, 512 }
  0x1c   :  { %v42_v3 = vld [vmem:[#allocation6] sm:$0x1]  ;;  %v43_v4 = vld [vmem:[#allocation8] sm:$0x1]  ;;  %s491_s13 = sshll.u32 %s646_s12, 4  ;;  %p569_p8 = scmp.ne.s32.totalorder %s469_s1, %s568_s14  ;;  %s970_s13 = int_to_ptr.vmem [resolvable:$true] %s491_s13 }
  0x1d   :  { %v45_v5 = vsub.f32 %v43_v4, %v42_v3  ;;  %v48_v6 = vmul.f32 %v43_v4, %v699_v1  ;;  %p573_p9 = scmp.lt.s32.totalorder %s469_s1, %s469_s1  ;;  %p574_p10 = scmp.lt.s32.totalorder %s568_s14, %s568_s14 }
  0x1f   :  { %v46_v8 = vmul.f32 %v45_v5, %v704_v2  ;;  %v49_v9 = vsub.f32 %v43_v4, %v48_v6  ;;  %p575_p11 = por %p574_p10, %p573_p9 }
  0x21   :  { %v47_v10 = vadd.f32 %v46_v8, %v42_v3  ;;  %v57_v11 = vadd.f32 %v49_v9, %v44_v7  ;;  %v162_v9 = vld [vmem:[#allocation2 + $0x9] sm:$0x1]  ;;  %p576_p12 = pnand %p575_p11, %p569_p8 }
  0x23   :  { %vm50_vm1 = vcmp.gt.f32.partialorder %v47_v10, 1.0  ;;  %v62_v12 = vmul.f32 %v57_v11, %v699_v1 }
  0x24   :  { %v507_v13 = vsel %vm50_vm1, 1.0, %v643_v0 }
  0x25   :  { %54 = vst.msk [vmem:[#allocation5] sm:$0x1] %vm37_vm0, %v507_v13  ;;  %v55_v15 = vmul.f32 %v507_v13, %v47_v10  ;;  %v63_v16 = vsub.f32 %v57_v11, %v62_v12 }
  0x27   :  { %v56_v17 = vsub.f32 %v47_v10, %v55_v15  ;;  %v70_v18 = vadd.f32 %v63_v16, %v58_v14  ;;  %v175_v16 = vld [vmem:[#allocation2 + $0xa] sm:$0x1] }
  0x29   :  { %v59_v19 = vsub.f32 %v57_v11, %v56_v17  ;;  %v75_v20 = vmul.f32 %v70_v18, %v699_v1 }
  0x2b   :  { %v60_v22 = vmul.f32 %v59_v19, %v704_v2  ;;  %v76_v23 = vsub.f32 %v70_v18, %v75_v20 }
  0x2d   :  { %v61_v24 = vadd.f32 %v60_v22, %v56_v17  ;;  %v83_v25 = vadd.f32 %v76_v23, %v71_v21  ;;  %v188_v23 = vld [vmem:[#allocation2 + $0xb] sm:$0x1] }
  0x2f   :  { %vm64_vm2 = vcmp.gt.f32.partialorder %v61_v24, 1.0  ;;  %v88_v26 = vmul.f32 %v83_v25, %v699_v1 }
  0x30   :  { %v508_v27 = vsel %vm64_vm2, 1.0, %v643_v0 }
  0x31   :  { %67 = vst.msk [vmem:[#allocation5 + $0x1] sm:$0x1] %vm37_vm0, %v508_v27  ;;  %v68_v29 = vmul.f32 %v508_v27, %v61_v24  ;;  %v89_v30 = vsub.f32 %v83_v25, %v88_v26 }
  0x33   :  { %v69_v31 = vsub.f32 %v61_v24, %v68_v29  ;;  %v96_v32 = vadd.f32 %v89_v30, %v84_v28  ;;  %v201_v30 = vld [vmem:[#allocation2 + $0xc] sm:$0x1] }
  0x35   :  { %v72_v33 = vsub.f32 %v70_v18, %v69_v31  ;;  %v101_v34 = vmul.f32 %v96_v32, %v699_v1 }
  0x37   :  { %v73_v36 = vmul.f32 %v72_v33, %v704_v2  ;;  %v102_v37 = vsub.f32 %v96_v32, %v101_v34 }
  0x39   :  { %v74_v38 = vadd.f32 %v73_v36, %v69_v31  ;;  %v109_v39 = vadd.f32 %v102_v37, %v97_v35  ;;  %v214_v37 = vld [vmem:[#allocation2 + $0xd] sm:$0x1] }
  0x3b   :  { %vm77_vm3 = vcmp.gt.f32.partialorder %v74_v38, 1.0  ;;  %v114_v40 = vmul.f32 %v109_v39, %v699_v1 }
  0x3c   :  { %v509_v41 = vsel %vm77_vm3, 1.0, %v643_v0 }
  0x3d   :  { %80 = vst.msk [vmem:[#allocation5 + $0x2] sm:$0x1] %vm37_vm0, %v509_v41  ;;  %v81_v43 = vmul.f32 %v509_v41, %v74_v38  ;;  %v115_v44 = vsub.f32 %v109_v39, %v114_v40 }
  0x3f   :  { %v82_v45 = vsub.f32 %v74_v38, %v81_v43  ;;  %v122_v46 = vadd.f32 %v115_v44, %v110_v42  ;;  %v227_v44 = vld [vmem:[#allocation2 + $0xe] sm:$0x1] }
  0x41   :  { %v85_v47 = vsub.f32 %v83_v25, %v82_v45  ;;  %v127_v48 = vmul.f32 %v122_v46, %v699_v1 }
  0x43   :  { %v86_v50 = vmul.f32 %v85_v47, %v704_v2  ;;  %v128_v51 = vsub.f32 %v122_v46, %v127_v48 }
  0x45   :  { %v87_v52 = vadd.f32 %v86_v50, %v82_v45  ;;  %v135_v53 = vadd.f32 %v128_v51, %v123_v49  ;;  %v240_v51 = vld [vmem:[#allocation2 + $0xf] sm:$0x1] }
  0x47   :  { %vm90_vm4 = vcmp.gt.f32.partialorder %v87_v52, 1.0  ;;  %v140_v54 = vmul.f32 %v135_v53, %v699_v1 }
  0x48   :  { %v510_v55 = vsel %vm90_vm4, 1.0, %v643_v0 }
  0x49   :  { %93 = vst.msk [vmem:[#allocation5 + $0x3] sm:$0x1] %vm37_vm0, %v510_v55  ;;  %v94_v57 = vmul.f32 %v510_v55, %v87_v52  ;;  %v141_v58 = vsub.f32 %v135_v53, %v140_v54 }
  0x4b   :  { %v95_v59 = vsub.f32 %v87_v52, %v94_v57  ;;  %v726_v60 = vadd.f32 %v141_v58, %v136_v56  ;;  %v253_v58 = vld [vmem:[#allocation2 + $0x10] sm:$0x1] }
  0x4d   :  { %v98_v61 = vsub.f32 %v96_v32, %v95_v59  ;;  %v153_v62 = vmul.f32 %v726_v60, %v699_v1 }
  0x4f   :  { %v99_v3 = vmul.f32 %v98_v61, %v704_v2  ;;  %v154_v4 = vsub.f32 %v726_v60, %v153_v62 }
  0x51   :  { %v100_v5 = vadd.f32 %v99_v3, %v95_v59  ;;  %v732_v6 = vadd.f32 %v154_v4, %v149_v63 }
  0x53   :  { %vm103_vm5 = vcmp.gt.f32.partialorder %v100_v5, 1.0  ;;  %v166_v7 = vmul.f32 %v732_v6, %v699_v1 }
  0x54   :  { %v511_v8 = vsel %vm103_vm5, 1.0, %v643_v0 }
  0x55   :  { %106 = vst.msk [vmem:[#allocation5 + $0x4] sm:$0x1] %vm37_vm0, %v511_v8  ;;  %v107_v10 = vmul.f32 %v511_v8, %v100_v5  ;;  %v167_v11 = vsub.f32 %v732_v6, %v166_v7 }
  0x57   :  { %v108_v12 = vsub.f32 %v100_v5, %v107_v10  ;;  %v739_v13 = vadd.f32 %v167_v11, %v162_v9  ;;  %v266_v5 = vld [vmem:[#allocation2 + $0x11] sm:$0x1] }
  0x59   :  { %v111_v14 = vsub.f32 %v109_v39, %v108_v12  ;;  %v179_v15 = vmul.f32 %v739_v13, %v699_v1 }
  0x5b   :  { %v112_v17 = vmul.f32 %v111_v14, %v704_v2  ;;  %v180_v18 = vsub.f32 %v739_v13, %v179_v15 }
  0x5d   :  { %v113_v19 = vadd.f32 %v112_v17, %v108_v12  ;;  %v745_v20 = vadd.f32 %v180_v18, %v175_v16  ;;  %v279_v12 = vld [vmem:[#allocation2 + $0x12] sm:$0x1] }
  0x5f   :  { %vm116_vm6 = vcmp.gt.f32.partialorder %v113_v19, 1.0  ;;  %v192_v21 = vmul.f32 %v745_v20, %v699_v1 }
  0x60   :  { %v512_v22 = vsel %vm116_vm6, 1.0, %v643_v0 }
  0x61   :  { %119 = vst.msk [vmem:[#allocation5 + $0x5] sm:$0x1] %vm37_vm0, %v512_v22  ;;  %v120_v24 = vmul.f32 %v512_v22, %v113_v19  ;;  %v193_v25 = vsub.f32 %v745_v20, %v192_v21  ;;  %v292_v21 = vld [vmem:[#allocation2 + $0x13] sm:$0x1] }
  0x63   :  { %v121_v26 = vsub.f32 %v113_v19, %v120_v24  ;;  %v752_v27 = vadd.f32 %v193_v25, %v188_v23 }
  0x65   :  { %v124_v28 = vsub.f32 %v122_v46, %v121_v26  ;;  %v205_v29 = vmul.f32 %v752_v27, %v699_v1 }
  0x67   :  { %v125_v31 = vmul.f32 %v124_v28, %v704_v2  ;;  %v206_v32 = vsub.f32 %v752_v27, %v205_v29  ;;  %v305_v28 = vld [vmem:[#allocation2 + $0x14] sm:$0x1] }
  0x69   :  { %v126_v33 = vadd.f32 %v125_v31, %v121_v26  ;;  %v758_v34 = vadd.f32 %v206_v32, %v201_v30 }
  0x6b   :  { %vm129_vm7 = vcmp.gt.f32.partialorder %v126_v33, 1.0  ;;  %v218_v35 = vmul.f32 %v758_v34, %v699_v1 }
  0x6c   :  { %v513_v36 = vsel %vm129_vm7, 1.0, %v643_v0 }
  0x6d   :  { %132 = vst.msk [vmem:[#allocation5 + $0x6] sm:$0x1] %vm37_vm0, %v513_v36  ;;  %v133_v38 = vmul.f32 %v513_v36, %v126_v33  ;;  %v219_v39 = vsub.f32 %v758_v34, %v218_v35  ;;  %v318_v36 = vld [vmem:[#allocation2 + $0x15] sm:$0x1] }
  0x6f   :  { %v134_v40 = vsub.f32 %v126_v33, %v133_v38  ;;  %v765_v41 = vadd.f32 %v219_v39, %v214_v37 }
  0x71   :  { %v137_v42 = vsub.f32 %v135_v53, %v134_v40  ;;  %v231_v43 = vmul.f32 %v765_v41, %v699_v1 }
  0x73   :  { %v138_v45 = vmul.f32 %v137_v42, %v704_v2  ;;  %v232_v46 = vsub.f32 %v765_v41, %v231_v43  ;;  %v331_v43 = vld [vmem:[#allocation2 + $0x16] sm:$0x1] }
  0x75   :  { %v139_v47 = vadd.f32 %v138_v45, %v134_v40  ;;  %v771_v48 = vadd.f32 %v232_v46, %v227_v44 }
  0x77   :  { %vm142_vm8 = vcmp.gt.f32.partialorder %v139_v47, 1.0  ;;  %v244_v49 = vmul.f32 %v771_v48, %v699_v1 }
  0x78   :  { %v514_v50 = vsel %vm142_vm8, 1.0, %v643_v0 }
  0x79   :  { %145 = vst.msk [vmem:[#allocation5 + $0x7] sm:$0x1] %vm37_vm0, %v514_v50  ;;  %v146_v52 = vmul.f32 %v514_v50, %v139_v47  ;;  %v245_v53 = vsub.f32 %v771_v48, %v244_v49 }
  0x7b   :  { %v147_v54 = vsub.f32 %v139_v47, %v146_v52  ;;  %v778_v55 = vadd.f32 %v245_v53, %v240_v51  ;;  %v344_v51 = vld [vmem:[#allocation2 + $0x17] sm:$0x1] }
  0x7d   :  { %v150_v56 = vsub.f32 %v726_v60, %v147_v54  ;;  %v257_v57 = vmul.f32 %v778_v55, %v699_v1 }
  0x7f   :  { %v151_v59 = vmul.f32 %v150_v56, %v704_v2  ;;  %v258_v61 = vsub.f32 %v778_v55, %v257_v57 }
  0x81   :  { %v152_v62 = vadd.f32 %v151_v59, %v147_v54  ;;  %v785_v63 = vadd.f32 %v258_v61, %v253_v58  ;;  %v357_v58 = vld [vmem:[#allocation2 + $0x18] sm:$0x1] }
  0x83   :  { %vm155_vm9 = vcmp.gt.f32.partialorder %v152_v62, 1.0  ;;  %v270_v3 = vmul.f32 %v785_v63, %v699_v1 }
  0x84   :  { %v515_v4 = vsel %vm155_vm9, 1.0, %v643_v0 }
  0x85   :  { %158 = vst.msk [vmem:[#allocation5 + $0x8] sm:$0x1] %vm37_vm0, %v515_v4  ;;  %v159_v60 = vmul.f32 %v515_v4, %v152_v62  ;;  %v271_v7 = vsub.f32 %v785_v63, %v270_v3 }
  0x87   :  { %v160_v8 = vsub.f32 %v152_v62, %v159_v60  ;;  %v792_v9 = vadd.f32 %v271_v7, %v266_v5  ;;  %v370_v60 = vld [vmem:[#allocation2 + $0x19] sm:$0x1] }
  0x89   :  { %v163_v10 = vsub.f32 %v732_v6, %v160_v8  ;;  %v283_v11 = vmul.f32 %v792_v9, %v699_v1 }
  0x8b   :  { %v164_v14 = vmul.f32 %v163_v10, %v704_v2  ;;  %v284_v15 = vsub.f32 %v792_v9, %v283_v11 }
  0x8d   :  { %v165_v16 = vadd.f32 %v164_v14, %v160_v8  ;;  %v799_v17 = vadd.f32 %v284_v15, %v279_v12  ;;  %v383_v14 = vld [vmem:[#allocation2 + $0x1a] sm:$0x1] }
  0x8f   :  { %vm168_vm10 = vcmp.gt.f32.partialorder %v165_v16, 1.0  ;;  %v296_v18 = vmul.f32 %v799_v17, %v699_v1 }
  0x90   :  { %v516_v19 = vsel %vm168_vm10, 1.0, %v643_v0 }
  0x91   :  { %171 = vst.msk [vmem:[#allocation5 + $0x9] sm:$0x1] %vm37_vm0, %v516_v19  ;;  %v172_v6 = vmul.f32 %v516_v19, %v165_v16  ;;  %v297_v22 = vsub.f32 %v799_v17, %v296_v18 }
  0x93   :  { %v173_v23 = vsub.f32 %v165_v16, %v172_v6  ;;  %v806_v24 = vadd.f32 %v297_v22, %v292_v21  ;;  %v396_v22 = vld [vmem:[#allocation2 + $0x1b] sm:$0x1] }
  0x95   :  { %v176_v25 = vsub.f32 %v739_v13, %v173_v23  ;;  %v309_v26 = vmul.f32 %v806_v24, %v699_v1 }
  0x97   :  { %v177_v29 = vmul.f32 %v176_v25, %v704_v2  ;;  %v310_v30 = vsub.f32 %v806_v24, %v309_v26 }
  0x99   :  { %v178_v31 = vadd.f32 %v177_v29, %v173_v23  ;;  %v813_v32 = vadd.f32 %v310_v30, %v305_v28  ;;  %v409_v30 = vld [vmem:[#allocation2 + $0x1c] sm:$0x1] }
  0x9b   :  { %vm181_vm11 = vcmp.gt.f32.partialorder %v178_v31, 1.0  ;;  %v322_v33 = vmul.f32 %v813_v32, %v699_v1 }
  0x9c   :  { %v517_v35 = vsel %vm181_vm11, 1.0, %v643_v0 }
  0x9d   :  { %184 = vst.msk [vmem:[#allocation5 + $0xa] sm:$0x1] %vm37_vm0, %v517_v35  ;;  %v185_v13 = vmul.f32 %v517_v35, %v178_v31  ;;  %v323_v37 = vsub.f32 %v813_v32, %v322_v33 }
  0x9f   :  { %v186_v38 = vsub.f32 %v178_v31, %v185_v13  ;;  %v820_v39 = vadd.f32 %v323_v37, %v318_v36 }
  0xa1   :  { %v189_v40 = vsub.f32 %v745_v20, %v186_v38  ;;  %v335_v42 = vmul.f32 %v820_v39, %v699_v1 }
  0xa3   :  { %v190_v44 = vmul.f32 %v189_v40, %v704_v2  ;;  %v336_v45 = vsub.f32 %v820_v39, %v335_v42 }
  0xa5   :  { %v191_v46 = vadd.f32 %v190_v44, %v186_v38  ;;  %v827_v47 = vadd.f32 %v336_v45, %v331_v43  ;;  %v422_v38 = vld [vmem:[#allocation2 + $0x1d] sm:$0x1] }
  0xa7   :  { %vm194_vm12 = vcmp.gt.f32.partialorder %v191_v46, 1.0  ;;  %v348_v49 = vmul.f32 %v827_v47, %v699_v1 }
  0xa8   :  { %v518_v50 = vsel %vm194_vm12, 1.0, %v643_v0 }
  0xa9   :  { %197 = vst.msk [vmem:[#allocation5 + $0xb] sm:$0x1] %vm37_vm0, %v518_v50  ;;  %v198_v20 = vmul.f32 %v518_v50, %v191_v46  ;;  %v349_v52 = vsub.f32 %v827_v47, %v348_v49 }
  0xab   :  { %v199_v53 = vsub.f32 %v191_v46, %v198_v20  ;;  %v834_v54 = vadd.f32 %v349_v52, %v344_v51  ;;  %v435_v46 = vld [vmem:[#allocation2 + $0x1e] sm:$0x1] }
  0xad   :  { %v202_v56 = vsub.f32 %v752_v27, %v199_v53  ;;  %v361_v57 = vmul.f32 %v834_v54, %v699_v1 }
  0xaf   :  { %v203_v59 = vmul.f32 %v202_v56, %v704_v2  ;;  %v362_v61 = vsub.f32 %v834_v54, %v361_v57  ;;  %v448_v56 = vld [vmem:[#allocation2 + $0x1f] sm:$0x1] }
  0xb1   :  { %v204_v62 = vadd.f32 %v203_v59, %v199_v53  ;;  %v841_v3 = vadd.f32 %v362_v61, %v357_v58 }
  0xb3   :  { %vm207_vm13 = vcmp.gt.f32.partialorder %v204_v62, 1.0  ;;  %v374_v4 = vmul.f32 %v841_v3, %v699_v1 }
  0xb4   :  { %v519_v5 = vsel %vm207_vm13, 1.0, %v643_v0 }
  0xb5   :  { %210 = vst.msk [vmem:[#allocation5 + $0xc] sm:$0x1] %vm37_vm0, %v519_v5  ;;  %v211_v27 = vmul.f32 %v519_v5, %v204_v62  ;;  %v375_v7 = vsub.f32 %v841_v3, %v374_v4 }
  0xb7   :  { %v212_v8 = vsub.f32 %v204_v62, %v211_v27  ;;  %v848_v10 = vadd.f32 %v375_v7, %v370_v60 }
  0xb9   :  { %v215_v11 = vsub.f32 %v758_v34, %v212_v8  ;;  %v387_v12 = vmul.f32 %v848_v10, %v699_v1 }
  0xbb   :  { %v216_v15 = vmul.f32 %v215_v11, %v704_v2  ;;  %v388_v16 = vsub.f32 %v848_v10, %v387_v12 }
  0xbd   :  { %v217_v18 = vadd.f32 %v216_v15, %v212_v8  ;;  %v855_v19 = vadd.f32 %v388_v16, %v383_v14 }
  0xbf   :  { %vm220_vm14 = vcmp.gt.f32.partialorder %v217_v18, 1.0  ;;  %v400_v21 = vmul.f32 %v855_v19, %v699_v1 }
  0xc0   :  { %v520_v6 = vsel %vm220_vm14, 1.0, %v643_v0 }
  0xc1   :  { %223 = vst.msk [vmem:[#allocation5 + $0xd] sm:$0x1] %vm37_vm0, %v520_v6  ;;  %v224_v34 = vmul.f32 %v520_v6, %v217_v18  ;;  %v401_v23 = vsub.f32 %v855_v19, %v400_v21 }
  0xc3   :  { %v225_v25 = vsub.f32 %v217_v18, %v224_v34  ;;  %v862_v26 = vadd.f32 %v401_v23, %v396_v22 }
  0xc5   :  { %v228_v28 = vsub.f32 %v765_v41, %v225_v25  ;;  %v413_v29 = vmul.f32 %v862_v26, %v699_v1 }
  0xc7   :  { %v229_v31 = vmul.f32 %v228_v28, %v704_v2  ;;  %v414_v33 = vsub.f32 %v862_v26, %v413_v29 }
  0xc9   :  { %v230_v35 = vadd.f32 %v229_v31, %v225_v25  ;;  %v869_v36 = vadd.f32 %v414_v33, %v409_v30 }
  0xcb   :  { %vm233_vm15 = vcmp.gt.f32.partialorder %v230_v35, 1.0  ;;  %v426_v13 = vmul.f32 %v869_v36, %v699_v1 }
  0xcc   :  { %v521_v37 = vsel %vm233_vm15, 1.0, %v643_v0 }
  0xcd   :  { %236 = vst.msk [vmem:[#allocation5 + $0xe] sm:$0x1] %vm37_vm0, %v521_v37  ;;  %v237_v41 = vmul.f32 %v521_v37, %v230_v35  ;;  %v427_v40 = vsub.f32 %v869_v36, %v426_v13 }
  0xcf   :  { %v238_v42 = vsub.f32 %v230_v35, %v237_v41  ;;  %v876_v43 = vadd.f32 %v427_v40, %v422_v38 }
  0xd1   :  { %v241_v44 = vsub.f32 %v771_v48, %v238_v42  ;;  %v439_v45 = vmul.f32 %v876_v43, %v699_v1 }
  0xd3   :  { %v242_v49 = vmul.f32 %v241_v44, %v704_v2  ;;  %v440_v50 = vsub.f32 %v876_v43, %v439_v45 }
  0xd5   :  { %v243_v51 = vadd.f32 %v242_v49, %v238_v42  ;;  %v883_v20 = vadd.f32 %v440_v50, %v435_v46 }
  0xd7   :  { %vm246_vm1 = vcmp.gt.f32.partialorder %v243_v51, 1.0  ;;  %v452_v52 = vmul.f32 %v883_v20, %v699_v1 }
  0xd8   :  { %v522_v53 = vsel %vm246_vm1, 1.0, %v643_v0 }
  0xd9   :  { %249 = vst.msk [vmem:[#allocation5 + $0xf] sm:$0x1] %vm37_vm0, %v522_v53  ;;  %v250_v48 = vmul.f32 %v522_v53, %v243_v51  ;;  %v453_v57 = vsub.f32 %v883_v20, %v452_v52 }
  0xdb   :  { %v251_v58 = vsub.f32 %v243_v51, %v250_v48  ;;  %v460_v59 = vadd.f32 %v453_v57, %v448_v56 }
  0xdd   :  { %v254_v61 = vsub.f32 %v778_v55, %v251_v58  ;;  %462 = vst.msk [vmem:[#allocation8] sm:$0x1] %vm37_vm0, %v460_v59 }
  0xdf   :  { %v255_v62 = vmul.f32 %v254_v61, %v704_v2 }
  0xe1   :  { %v256_v4 = vadd.f32 %v255_v62, %v251_v58 }
  0xe3   :  { %vm259_vm2 = vcmp.gt.f32.partialorder %v256_v4, 1.0 }
  0xe4   :  { %v523_v1 = vsel %vm259_vm2, 1.0, %v643_v0 }
  0xe5   :  { %262 = vst.msk [vmem:[#allocation5 + $0x10] sm:$0x1] %vm37_vm0, %v523_v1  ;;  %v263_v5 = vmul.f32 %v523_v1, %v256_v4 }
  0xe7   :  { %v264_v60 = vsub.f32 %v256_v4, %v263_v5 }
  0xe9   :  { %v267_v27 = vsub.f32 %v785_v63, %v264_v60 }
  0xeb   :  { %v268_v7 = vmul.f32 %v267_v27, %v704_v2 }
  0xed   :  { %v269_v8 = vadd.f32 %v268_v7, %v264_v60 }
  0xef   :  { %vm272_vm3 = vcmp.gt.f32.partialorder %v269_v8, 1.0 }
  0xf0   :  { %v524_v55 = vsel %vm272_vm3, 1.0, %v643_v0 }
  0xf1   :  { %275 = vst.msk [vmem:[#allocation5 + $0x11] sm:$0x1] %vm37_vm0, %v524_v55  ;;  %v276_v11 = vmul.f32 %v524_v55, %v269_v8 }
  0xf3   :  { %v277_v12 = vsub.f32 %v269_v8, %v276_v11 }
  0xf5   :  { %v280_v14 = vsub.f32 %v792_v9, %v277_v12 }
  0xf7   :  { %v281_v15 = vmul.f32 %v280_v14, %v704_v2 }
  0xf9   :  { %v282_v16 = vadd.f32 %v281_v15, %v277_v12 }
  0xfb   :  { %vm285_vm4 = vcmp.gt.f32.partialorder %v282_v16, 1.0 }
  0xfc   :  { %v525_v18 = vsel %vm285_vm4, 1.0, %v643_v0 }
  0xfd   :  { %288 = vst.msk [vmem:[#allocation5 + $0x12] sm:$0x1] %vm37_vm0, %v525_v18  ;;  %v289_v63 = vmul.f32 %v525_v18, %v282_v16 }
  0xff   :  { %v290_v21 = vsub.f32 %v282_v16, %v289_v63 }
 0x101   :  { %v293_v6 = vsub.f32 %v799_v17, %v290_v21 }
 0x103   :  { %v294_v22 = vmul.f32 %v293_v6, %v704_v2 }
 0x105   :  { %v295_v34 = vadd.f32 %v294_v22, %v290_v21 }
 0x107   :  { %vm298_vm5 = vcmp.gt.f32.partialorder %v295_v34, 1.0 }
 0x108   :  { %v526_v23 = vsel %vm298_vm5, 1.0, %v643_v0 }
 0x109   :  { %301 = vst.msk [vmem:[#allocation5 + $0x13] sm:$0x1] %vm37_vm0, %v526_v23  ;;  %v302_v9 = vmul.f32 %v526_v23, %v295_v34 }
 0x10b   :  { %v303_v25 = vsub.f32 %v295_v34, %v302_v9 }
 0x10d   :  { %v306_v28 = vsub.f32 %v806_v24, %v303_v25 }
 0x10f   :  { %v307_v29 = vmul.f32 %v306_v28, %v704_v2 }
 0x111   :  { %v308_v30 = vadd.f32 %v307_v29, %v303_v25 }
 0x113   :  { %vm311_vm6 = vcmp.gt.f32.partialorder %v308_v30, 1.0 }
 0x114   :  { %v527_v31 = vsel %vm311_vm6, 1.0, %v643_v0 }
 0x115   :  { %314 = vst.msk [vmem:[#allocation5 + $0x14] sm:$0x1] %vm37_vm0, %v527_v31  ;;  %v315_v17 = vmul.f32 %v527_v31, %v308_v30 }
 0x117   :  { %v316_v33 = vsub.f32 %v308_v30, %v315_v17 }
 0x119   :  { %v319_v35 = vsub.f32 %v813_v32, %v316_v33 }
 0x11b   :  { %v320_v13 = vmul.f32 %v319_v35, %v704_v2 }
 0x11d   :  { %v321_v37 = vadd.f32 %v320_v13, %v316_v33 }
 0x11f   :  { %vm324_vm7 = vcmp.gt.f32.partialorder %v321_v37, 1.0 }
 0x120   :  { %v528_v38 = vsel %vm324_vm7, 1.0, %v643_v0 }
 0x121   :  { %327 = vst.msk [vmem:[#allocation5 + $0x15] sm:$0x1] %vm37_vm0, %v528_v38  ;;  %v328_v24 = vmul.f32 %v528_v38, %v321_v37 }
 0x123   :  { %v329_v41 = vsub.f32 %v321_v37, %v328_v24 }
 0x125   :  { %v332_v40 = vsub.f32 %v820_v39, %v329_v41 }
 0x127   :  { %v333_v42 = vmul.f32 %v332_v40, %v704_v2 }
 0x129   :  { %v334_v44 = vadd.f32 %v333_v42, %v329_v41 }
 0x12b   :  { %vm337_vm8 = vcmp.gt.f32.partialorder %v334_v44, 1.0 }
 0x12c   :  { %v529_v45 = vsel %vm337_vm8, 1.0, %v643_v0 }
 0x12d   :  { %340 = vst.msk [vmem:[#allocation5 + $0x16] sm:$0x1] %vm37_vm0, %v529_v45  ;;  %v341_v32 = vmul.f32 %v529_v45, %v334_v44 }
 0x12f   :  { %v342_v46 = vsub.f32 %v334_v44, %v341_v32 }
 0x131   :  { %v345_v49 = vsub.f32 %v827_v47, %v342_v46 }
 0x133   :  { %v346_v50 = vmul.f32 %v345_v49, %v704_v2 }
 0x135   :  { %v347_v51 = vadd.f32 %v346_v50, %v342_v46 }
 0x137   :  { %vm350_vm9 = vcmp.gt.f32.partialorder %v347_v51, 1.0 }
 0x138   :  { %v530_v52 = vsel %vm350_vm9, 1.0, %v643_v0 }
 0x139   :  { %353 = vst.msk [vmem:[#allocation5 + $0x17] sm:$0x1] %vm37_vm0, %v530_v52  ;;  %v354_v39 = vmul.f32 %v530_v52, %v347_v51 }
 0x13b   :  { %v355_v53 = vsub.f32 %v347_v51, %v354_v39 }
 0x13d   :  { %v358_v56 = vsub.f32 %v834_v54, %v355_v53 }
 0x13f   :  { %v359_v48 = vmul.f32 %v358_v56, %v704_v2 }
 0x141   :  { %v360_v57 = vadd.f32 %v359_v48, %v355_v53 }
 0x143   :  { %vm363_vm10 = vcmp.gt.f32.partialorder %v360_v57, 1.0 }
 0x144   :  { %v531_v58 = vsel %vm363_vm10, 1.0, %v643_v0 }
 0x145   :  { %366 = vst.msk [vmem:[#allocation5 + $0x18] sm:$0x1] %vm37_vm0, %v531_v58  ;;  %v367_v47 = vmul.f32 %v531_v58, %v360_v57 }
 0x147   :  { %v368_v59 = vsub.f32 %v360_v57, %v367_v47 }
 0x149   :  { %v371_v61 = vsub.f32 %v841_v3, %v368_v59 }
 0x14b   :  { %v372_v62 = vmul.f32 %v371_v61, %v704_v2 }
 0x14d   :  { %v373_v4 = vadd.f32 %v372_v62, %v368_v59 }
 0x14f   :  { %vm376_vm11 = vcmp.gt.f32.partialorder %v373_v4, 1.0 }
 0x150   :  { %v532_v1 = vsel %vm376_vm11, 1.0, %v643_v0 }
 0x151   :  { %379 = vst.msk [vmem:[#allocation5 + $0x19] sm:$0x1] %vm37_vm0, %v532_v1  ;;  %v380_v54 = vmul.f32 %v532_v1, %v373_v4 }
 0x153   :  { %v381_v5 = vsub.f32 %v373_v4, %v380_v54 }
 0x155   :  { %v384_v60 = vsub.f32 %v848_v10, %v381_v5 }
 0x157   :  { %v385_v27 = vmul.f32 %v384_v60, %v704_v2 }
 0x159   :  { %v386_v7 = vadd.f32 %v385_v27, %v381_v5 }
 0x15b   :  { %vm389_vm12 = vcmp.gt.f32.partialorder %v386_v7, 1.0 }
 0x15c   :  { %v533_v8 = vsel %vm389_vm12, 1.0, %v643_v0 }
 0x15d   :  { %392 = vst.msk [vmem:[#allocation5 + $0x1a] sm:$0x1] %vm37_vm0, %v533_v8  ;;  %v393_v3 = vmul.f32 %v533_v8, %v386_v7 }
 0x15f   :  { %v394_v55 = vsub.f32 %v386_v7, %v393_v3 }
 0x161   :  { %v397_v11 = vsub.f32 %v855_v19, %v394_v55 }
 0x163   :  { %v398_v12 = vmul.f32 %v397_v11, %v704_v2 }
 0x165   :  { %v399_v14 = vadd.f32 %v398_v12, %v394_v55 }
 0x167   :  { %vm402_vm13 = vcmp.gt.f32.partialorder %v399_v14, 1.0 }
 0x168   :  { %v534_v15 = vsel %vm402_vm13, 1.0, %v643_v0 }
 0x169   :  { %405 = vst.msk [vmem:[#allocation5 + $0x1b] sm:$0x1] %vm37_vm0, %v534_v15  ;;  %v406_v10 = vmul.f32 %v534_v15, %v399_v14 }
 0x16b   :  { %v407_v16 = vsub.f32 %v399_v14, %v406_v10 }
 0x16d   :  { %v410_v18 = vsub.f32 %v862_v26, %v407_v16 }
 0x16f   :  { %v411_v63 = vmul.f32 %v410_v18, %v704_v2 }
 0x171   :  { %v412_v21 = vadd.f32 %v411_v63, %v407_v16 }
 0x173   :  { %vm415_vm14 = vcmp.gt.f32.partialorder %v412_v21, 1.0 }
 0x174   :  { %v535_v6 = vsel %vm415_vm14, 1.0, %v643_v0 }
 0x175   :  { %418 = vst.msk [vmem:[#allocation5 + $0x1c] sm:$0x1] %vm37_vm0, %v535_v6  ;;  %v419_v19 = vmul.f32 %v535_v6, %v412_v21 }
 0x177   :  { %v420_v22 = vsub.f32 %v412_v21, %v419_v19 }
 0x179   :  { %v423_v34 = vsub.f32 %v869_v36, %v420_v22 }
 0x17b   :  { %v424_v23 = vmul.f32 %v423_v34, %v704_v2 }
 0x17d   :  { %v425_v9 = vadd.f32 %v424_v23, %v420_v22 }
 0x17f   :  { %vm428_vm15 = vcmp.gt.f32.partialorder %v425_v9, 1.0 }
 0x180   :  { %v536_v25 = vsel %vm428_vm15, 1.0, %v643_v0 }
 0x181   :  { %431 = vst.msk [vmem:[#allocation5 + $0x1d] sm:$0x1] %vm37_vm0, %v536_v25  ;;  %v432_v26 = vmul.f32 %v536_v25, %v425_v9 }
 0x183   :  { %v433_v28 = vsub.f32 %v425_v9, %v432_v26 }
 0x185   :  { %v436_v29 = vsub.f32 %v876_v43, %v433_v28 }
 0x187   :  { %v437_v30 = vmul.f32 %v436_v29, %v704_v2 }
 0x189   :  { %v438_v31 = vadd.f32 %v437_v30, %v433_v28 }
 0x18b   :  { %vm441_vm1 = vcmp.gt.f32.partialorder %v438_v31, 1.0 }
 0x18c   :  { %v537_v17 = vsel %vm441_vm1, 1.0, %v643_v0 }
 0x18d   :  { %444 = vst.msk [vmem:[#allocation5 + $0x1e] sm:$0x1] %vm37_vm0, %v537_v17  ;;  %v445_v36 = vmul.f32 %v537_v17, %v438_v31 }
 0x18f   :  { %v446_v33 = vsub.f32 %v438_v31, %v445_v36 }
 0x191   :  { %v449_v35 = vsub.f32 %v883_v20, %v446_v33 }
 0x193   :  { %v450_v13 = vmul.f32 %v449_v35, %v704_v2 }
 0x195   :  { %v451_v37 = vadd.f32 %v450_v13, %v446_v33 }
 0x197   :  { %vm454_vm2 = vcmp.gt.f32.partialorder %v451_v37, 1.0 }
 0x198   :  { %v538_v43 = vsel %vm454_vm2, 1.0, %v643_v0 }
 0x199   :  { %457 = vst.msk [vmem:[#allocation5 + $0x1f] sm:$0x1] %vm37_vm0, %v538_v43  ;;  %v458_v38 = vmul.f32 %v538_v43, %v451_v37 }
 0x19a   :  { %579 = shalt.err (!%p576_p12)
}
 0x19b   :  { %s580_s17 = scalar_lea.hbm %s1006_s3, 512 }
 0x19c   :  { %p581_p13 = scmp.ne.s32.totalorder %s1006_s3, %s580_s17  ;;  %p584_p0 = scmp.lt.u32.totalorder %s580_s17, %s1006_s3 }
 0x19e   :  { %p586_p1 = pnand %p584_p0, %p581_p13 }
 0x1a0   :  { %589 = shalt.err (!%p586_p1)
}
 0x1a1   :  { %474 = dma.vmem_to_hbm [thread:$0]  %s469_s1, 512, %s1006_s3, [#allocation4], %s641_s28, %s641_s28, %s642_s29   ;;  %v459_v0 = vsub.f32 %v451_v37, %v458_v38 }
 0x1a2   :  { %s590_s24 = scalar_lea.vmem %s482_s11, 16  ;;  %s594_s25 = scalar_lea.vmem %s482_s11, 32 }
 0x1a3   :  { %461 = vst.msk [vmem:[#allocation6] sm:$0x1] %vm37_vm0, %v459_v0  ;;  %p591_p2 = scmp.ne.s32.totalorder %s482_s11, %s590_s24  ;;  %p595_p3 = scmp.lt.s32.totalorder %s482_s11, %s482_s11 }
 0x1a4   :  { %p596_p4 = scmp.lt.s32.totalorder %s594_s25, %s590_s24 }
 0x1a6   :  { %p597_p5 = por %p596_p4, %p595_p3 }
 0x1a8   :  { %p598_p6 = pnand %p597_p5, %p591_p2 }
 0x1aa   :  { %601 = shalt.err (!%p598_p6)
}
 0x1ab   :  { %s602_s30 = scalar_lea.hbm %s1007_s4, 16 }
 0x1ac   :  { %p603_p7 = scmp.ne.s32.totalorder %s1007_s4, %s602_s30  ;;  %p606_p8 = scmp.lt.u32.totalorder %s602_s30, %s1007_s4 }
 0x1ae   :  { %p608_p9 = pnand %p606_p8, %p603_p7 }
 0x1b0   :  { %611 = shalt.err (!%p608_p9)
}
 0x1b1   :  { %484 = dma.vmem_to_hbm [thread:$0]  %s482_s11, 16, %s1007_s4, [#allocation7]  }
 0x1b2   :  { %s612_s9 = scalar_lea.vmem %s970_s13, 16  ;;  %s616_s10 = scalar_lea.vmem %s970_s13, 32 }
 0x1b3   :  { %p613_p10 = scmp.ne.s32.totalorder %s970_s13, %s612_s9  ;;  %p617_p11 = scmp.lt.s32.totalorder %s970_s13, %s970_s13 }
 0x1b4   :  { %p618_p12 = scmp.lt.s32.totalorder %s616_s10, %s612_s9 }
 0x1b6   :  { %p619_p13 = por %p618_p12, %p617_p11 }
 0x1b8   :  { %p620_p0 = pnand %p619_p13, %p613_p10 }
 0x1ba   :  { %623 = shalt.err (!%p620_p0)
}
 0x1bb   :  { %s624_s2 = scalar_lea.hbm %s1008_s5, 16 }
 0x1bc   :  { %p625_p1 = scmp.ne.s32.totalorder %s1008_s5, %s624_s2  ;;  %p628_p2 = scmp.lt.u32.totalorder %s624_s2, %s1008_s5 }
 0x1be   :  { %p630_p3 = pnand %p628_p2, %p625_p1 }
 0x1c0   :  { %633 = shalt.err (!%p630_p3)
}
 0x1c1   :  { %494 = dma.vmem_to_hbm [thread:$0]  %s970_s13, 16, %s1008_s5, [#allocation7]  }
 0x1c2   :  { %636 = dma.done.wait [#allocation4], 512  }
 0x1c3   :  { %637 = vsyncadd [#allocation4], 4294966784 }
 0x1c4   :  { %638 = dma.done.wait [#allocation7], 32  }
 0x1c5   :  { %639 = vsyncadd [#allocation7], 4294967264 }
 0x1c6   :  { %504 = vsyncpa [#allocation3], 1 }
 0x1c7   :  { %505 = vsyncpa [#allocation4], 1 }
 0x1c8   :  { %506 = vsyncpa [#allocation7], 1 }

</bundles_post_ra>
